<compile_context>
chip_gen: v5e
topology: v5e:2x2
jax: 0.10.0
libtpu: 0.0.40
codegen_flags: <defaults>
</compile_context>

<pallas_src>
import numpy as np

import jax
import jax.numpy as jnp
from jax.experimental import pallas as pl
from jax.experimental.pallas import tpu as pltpu  # noqa: F401  (TPU backend)
from jax.scipy.linalg import block_diag as _block_diag

NUM_TASKS = 10
NUM_EXPERTS = 3 + 1          # 3 generic + 1 task-specific-group expert (E = 4)
MU = 0.01
EPS = 1e-6                   # torch.ones_like(w) / 1e6


# ---------------------------------------------------------------------------
# Pallas kernel: both Q branches in ONE grid-less step (block-diag fused)
# ---------------------------------------------------------------------------
def _qnet_kernel(obs_ref, act_ref,
                 w1o_ref, w1a_ref, wbd_ref, ball_ref,
                 ew1_ref, eb_ref, ew2bd_ref, kvbd_ref,
                 tqp_ref, w6f_ref, b6_ref,
                 seg_ref, segT_ref, fold_ref, tile_ref,
                 q1_ref, q2_ref, reg_ref):
    f32 = jnp.float32
    obs = obs_ref[...]                                # (B, OBS_SIZE) incl. one-hot tail
    act = act_ref[...]                                # (B, A)
    B = obs.shape[0]
    EH2 = ew2bd_ref.shape[0]                          # 2 * E * H  (= 256)
    E2 = seg_ref.shape[1]                             # 2 * E      (= 8)
    E = E2 // 2

    def dot(a, b):
        return jnp.dot(a, b, preferred_element_type=f32)

    biases = ball_ref[...]                            # (5, 2H): b1..b5 [branch1 | branch2]

    # ---- backbone MLP (both branches block-diagonal in lanes) --------------
    h = jnp.maximum(dot(obs, w1o_ref[...]) + dot(act, w1a_ref[...])
                    + biases[0:1, :], 0.0)            # linear1  (B, 2H)
    h = jnp.maximum(dot(h, wbd_ref[0]) + biases[1:2, :], 0.0)   # linear2
    h = jnp.maximum(dot(h, wbd_ref[1]) + biases[2:3, :], 0.0)   # linear3

    # ---- MoE experts: all 2*E experts fused, lane-dense ---------------------
    eo = jnp.maximum(dot(h, ew1_ref[...]) + eb_ref[0:1, :], 0.0)       # (B, 2EH)
    eo = jnp.maximum(dot(eo, ew2bd_ref[...]) + eb_ref[1:2, :], 0.0)    # (B, 2EH)
    kv = dot(eo, kvbd_ref[...])                                        # (B, 4EH)
    keys = kv[:, :EH2]                                                 # (B, 2EH)
    vals = kv[:, EH2:]                                                 # (B, 2EH)

    seg = seg_ref[...]                                # (2EH, 2E) per-expert indicator
    segT = segT_ref[...]                              # (2E, 2EH)
    fold = fold_ref[...]                              # (2EH, 2H) sum-over-experts per branch
    tileM = tile_ref[...]                             # (2H, 2EH) = fold.T (query tiling)

    # ---- cosine similarity of expert value vectors (batch mean, sim1+sim2) --
    ssq = dot(vals * vals, seg)                                        # (B, 2E)
    inv_norm = jax.lax.rsqrt(jnp.maximum(ssq, 1e-24))                  # ~ 1/max(||v||,1e-12)
    vn = vals * dot(inv_norm, segT)                                    # (B, 2EH) normalized
    # sum_{l<m} <vn_l, vn_m> == 0.5 * (||sum_l vn_l||^2 - sum_l ||vn_l||^2), per branch
    vn_fold = dot(vn, fold)                                            # (B, 2H)
    sim_sum = 0.5 * (jnp.sum(vn_fold * vn_fold) - jnp.sum(vn * vn))
    n_pairs = E * (E - 1) // 2
    sim_total = sim_sum * (1.0 / float(n_pairs * B))                   # = sim_1 + sim_2

    # ---- attention over experts (task one-hot lives in the obs tail) -------
    q_sel = dot(obs, tqp_ref[...])                                     # (B, 2H) task queries
    q_tiled = dot(q_sel, tileM)                                        # (B, 2EH)
    scores = dot(keys * q_tiled, seg)                                  # (B, 2E)

    # per-branch softmax over each branch's E experts (exact division)
    lane = jax.lax.broadcasted_iota(jnp.int32, scores.shape, 1)
    in_b1 = lane < E
    m1 = jnp.max(jnp.where(in_b1, scores, -1e30), axis=-1, keepdims=True)
    m2 = jnp.max(jnp.where(in_b1, -1e30, scores), axis=-1, keepdims=True)
    es = jnp.exp(scores - jnp.where(in_b1, m1, m2))
    s1 = jnp.sum(jnp.where(in_b1, es, 0.0), axis=-1, keepdims=True)
    s2 = jnp.sum(jnp.where(in_b1, 0.0, es), axis=-1, keepdims=True)
    weights = es / jnp.where(in_b1, s1, s2)                            # (B, 2E)

    tower = dot(dot(weights, segT) * vals, fold)                       # (B, 2H)

    reg = (-(1.0 / E) * MU) * jnp.sum(jnp.log(weights + EPS),
                                      axis=-1, keepdims=True)          # (B, 1)
    reg = reg + MU * sim_total                                         # reg_1 + reg_2

    # ---- twin Q heads --------------------------------------------------------
    x = jnp.maximum(dot(tower, wbd_ref[2]) + biases[3:4, :], 0.0)      # linear4
    x = jnp.maximum(dot(x, wbd_ref[3]) + biases[4:5, :], 0.0)          # linear5
    q_both = dot(x, w6f_ref[...]) + b6_ref[...]                        # (B, 2)

    q1_ref[...] = q_both[:, 0:1]
    q2_ref[...] = q_both[:, 1:2]
    reg_ref[...] = reg


def qnetwork_pallas(obs, action, packed):
    B = obs.shape[0]
    q1, q2, reg = pl.pallas_call(
        _qnet_kernel,
        out_shape=(jax.ShapeDtypeStruct((B, 1), jnp.float32),
                   jax.ShapeDtypeStruct((B, 1), jnp.float32),
                   jax.ShapeDtypeStruct((B, 1), jnp.float32)),
    )(obs, action,
      packed["w1_obs"], packed["w1_act"], packed["wbd"], packed["b_all"],
      packed["ew1"], packed["eb"], packed["ew2bd"], packed["kvbd"],
      packed["tq_pad"], packed["w6fold"], packed["b6"],
      packed["seg"], packed["segT"], packed["fold"], packed["tile"])
    return q1, q2, reg.reshape(-1)


def qnetwork_forward(obs, action, packed):
    # obs = [features | one-hot task]; the one-hot tail is consumed in-kernel
    # (zero rows of w1_obs, task-query rows of tq_pad) -> no argmax/concat glue.
    # TODO(synk): exact utils.format_obs not available; assumed trailing one-hot task id.
    return qnetwork_pallas(obs, action, packed)


# ---------------------------------------------------------------------------
# Parameter construction (deterministic, synthetic) + one-time packing
# ---------------------------------------------------------------------------
def _linear(key, fan_in, fan_out):
    kw, kb = jax.random.split(key)
    bound = 1.0 / (fan_in ** 0.5)
    w = jax.random.uniform(kw, (fan_in, fan_out), jnp.float32, -bound, bound)
    b = jax.random.uniform(kb, (1, fan_out), jnp.float32, -bound, bound)
    return w, b


def init_branch_params(key, in_dim, hidden):
    ks = jax.random.split(key, 16)
    p = {}
    p["w1"], p["b1"] = _linear(ks[0], in_dim, hidden)
    p["w2"], p["b2"] = _linear(ks[1], hidden, hidden)
    p["w3"], p["b3"] = _linear(ks[2], hidden, hidden)
    p["w4"], p["b4"] = _linear(ks[3], hidden, hidden)
    p["w5"], p["b5"] = _linear(ks[4], hidden, hidden)
    p["w6"], p["b6"] = _linear(ks[5], hidden, 1)
    bound = 1.0 / (hidden ** 0.5)
    p["ew1"] = jax.random.uniform(ks[6], (NUM_EXPERTS, hidden, hidden), jnp.float32, -bound, bound)
    p["eb1"] = jax.random.uniform(ks[7], (NUM_EXPERTS, 1, hidden), jnp.float32, -bound, bound)
    p["ew2"] = jax.random.uniform(ks[8], (NUM_EXPERTS, hidden, hidden), jnp.float32, -bound, bound)
    p["eb2"] = jax.random.uniform(ks[9], (NUM_EXPERTS, 1, hidden), jnp.float32, -bound, bound)
    # kaiming_uniform_(a=sqrt(5)) ~= U(-1/sqrt(fan_in), 1/sqrt(fan_in))
    p["key_m"] = jax.random.uniform(ks[10], (NUM_EXPERTS, hidden, hidden), jnp.float32, -bound, bound)
    p["val_m"] = jax.random.uniform(ks[11], (NUM_EXPERTS, hidden, hidden), jnp.float32, -bound, bound)
    p["task_queries"] = jax.random.uniform(ks[12], (NUM_TASKS, hidden), jnp.float32, -bound, bound)
    return p


def pack_qnetwork_params(p1, p2, obs_size):
    """Pack BOTH branches into block-diagonal lane-dense tensors (done once, eagerly)."""
    H = p1["w2"].shape[0]
    E = NUM_EXPERTS
    T = NUM_TASKS
    feat = obs_size - T

    # linear1 split: obs part (zero rows over the one-hot tail) + action part
    w1o = jnp.concatenate([p1["w1"][:feat], p2["w1"][:feat]], axis=1)         # (feat, 2H)
    w1o = jnp.concatenate([w1o, jnp.zeros((T, 2 * H), jnp.float32)], axis=0)  # (obs_size, 2H)
    w1a = jnp.concatenate([p1["w1"][feat:], p2["w1"][feat:]], axis=1)         # (A, 2H)

    wbd = jnp.stack([_block_diag(p1[k], p2[k]) for k in ("w2", "w3", "w4", "w5")], axis=0)
    b_all = jnp.stack([jnp.concatenate([p1[k][0], p2[k][0]], axis=0)
                       for k in ("b1", "b2", "b3", "b4", "b5")], axis=0)      # (5, 2H)

    def cat_e(w):                                   # (E,H,H) -> (H, E*H)
        return jnp.concatenate([w[e] for e in range(E)], axis=1)

    ew1 = _block_diag(cat_e(p1["ew1"]), cat_e(p2["ew1"]))                     # (2H, 2EH)
    eb = jnp.stack([jnp.concatenate([p1["eb1"].reshape(-1), p2["eb1"].reshape(-1)]),
                    jnp.concatenate([p1["eb2"].reshape(-1), p2["eb2"].reshape(-1)])],
                   axis=0)                                                    # (2, 2EH)
    ew2bd = _block_diag(*([p1["ew2"][e] for e in range(E)] +
                          [p2["ew2"][e] for e in range(E)]))                  # (2EH, 2EH)
    kbd = _block_diag(*([p1["key_m"][e] for e in range(E)] +
                        [p2["key_m"][e] for e in range(E)]))
    vbd = _block_diag(*([p1["val_m"][e] for e in range(E)] +
                        [p2["val_m"][e] for e in range(E)]))
    kvbd = jnp.concatenate([kbd, vbd], axis=1)                                # (2EH, 4EH)

    tqp = jnp.concatenate(
        [jnp.zeros((feat, 2 * H), jnp.float32),
         jnp.concatenate([p1["task_queries"], p2["task_queries"]], axis=1)],
        axis=0)                                                               # (obs_size, 2H)
    w6f = _block_diag(p1["w6"], p2["w6"])                                     # (2H, 2)
    b6 = jnp.concatenate([p1["b6"], p2["b6"]], axis=1)                        # (1, 2)

    # constant indicator matrices (precomputed once; never rebuilt in-kernel)
    eh2 = 2 * E * H
    r = np.arange(eh2)
    seg = (r[:, None] // H == np.arange(2 * E)[None, :]).astype(np.float32)   # (2EH, 2E)
    fold = np.zeros((eh2, 2 * H), np.float32)
    fold[r, (r % H) + H * (r // (E * H))] = 1.0                               # (2EH, 2H)

    return {"w1_obs": w1o, "w1_act": w1a, "wbd": wbd, "b_all": b_all,
            "ew1": ew1, "eb": eb, "ew2bd": ew2bd, "kvbd": kvbd,
            "tq_pad": tqp, "w6fold": w6f, "b6": b6,
            "seg": jnp.asarray(seg), "segT": jnp.asarray(seg.T),
            "fold": jnp.asarray(fold), "tile": jnp.asarray(fold.T)}


# ---------------------------------------------------------------------------
# Pure-JAX reference of the PyTorch forward (for correctness check)
# ---------------------------------------------------------------------------
def _reference_branch(xu, task, p):
    relu = jax.nn.relu
    h = relu(xu @ p["w1"] + p["b1"])
    h = relu(h @ p["w2"] + p["b2"])
    h = relu(h @ p["w3"] + p["b3"])
    eo = jnp.stack([relu(relu(h @ p["ew1"][e] + p["eb1"][e]) @ p["ew2"][e] + p["eb2"][e])
                    for e in range(NUM_EXPERTS)], axis=1)              # (B,E,H)
    keys = jnp.einsum("kli,lij->klj", eo, p["key_m"])
    vals = jnp.einsum("kli,lij->klj", eo, p["val_m"])
    vn = vals / jnp.maximum(jnp.linalg.norm(vals, axis=-1, keepdims=True), 1e-12)
    sim = jnp.einsum("kli,kmi->klm", vn, vn)
    iu = jnp.triu_indices(NUM_EXPERTS, k=1)
    similarity = sim[:, iu[0], iu[1]].mean()
    q_sel = p["task_queries"][task]
    scores = jnp.einsum("kni,ki->kn", keys, q_sel)
    w = jax.nn.softmax(scores, axis=-1)
    tower = jnp.einsum("kn,kni->ki", w, vals)
    reg = -(1.0 / NUM_EXPERTS) * MU * jnp.sum(jnp.log(w + EPS), axis=-1) + MU * similarity
    x = relu(tower @ p["w4"] + p["b4"])
    x = relu(x @ p["w5"] + p["b5"])
    q = x @ p["w6"] + p["b6"]
    return q, reg


def _reference_forward(obs, action, p1, p2, obs_size):
    feat = obs_size - NUM_TASKS
    task = jnp.argmax(obs[:, feat:], axis=1)
    xu = jnp.concatenate([obs[:, :feat], action], axis=1)
    q1, r1 = _reference_branch(xu, task, p1)
    q2, r2 = _reference_branch(xu, task, p2)
    return q1, q2, r1 + r2


if __name__ == "__main__":
    B = 8
    OBS_SIZE = 22            # 12 real features + 10 one-hot task dims
    ACTION_SIZE = 4
    HIDDEN = 32
    IN_DIM = OBS_SIZE - NUM_TASKS + ACTION_SIZE

    root = jax.random.PRNGKey(0)
    k_obs, k_act, k_task, k_p1, k_p2 = jax.random.split(root, 5)

    obs_feat = jax.random.normal(k_obs, (B, OBS_SIZE - NUM_TASKS), jnp.float32)
    task_ids = jax.random.randint(k_task, (B,), 0, NUM_TASKS)
    one_hot = jax.nn.one_hot(task_ids, NUM_TASKS, dtype=jnp.float32)
    obs = jnp.concatenate([obs_feat, one_hot], axis=1)                 # (B, OBS_SIZE)
    action = jax.random.normal(k_act, (B, ACTION_SIZE), jnp.float32)

    params1 = init_branch_params(k_p1, IN_DIM, HIDDEN)
    params2 = init_branch_params(k_p2, IN_DIM, HIDDEN)
    packed = pack_qnetwork_params(params1, params2, OBS_SIZE)

    fwd = jax.jit(qnetwork_forward)
    q1, q2, reg = fwd(obs, action, packed)
    jax.block_until_ready((q1, q2, reg))

    # correctness vs. pure-JAX reference of the module forward
    rq1, rq2, rreg = _reference_forward(obs, action, params1, params2, OBS_SIZE)
    assert q1.shape == (B, 1) and q2.shape == (B, 1) and reg.shape == (B,)
    assert bool(jnp.all(jnp.isfinite(q1))) and bool(jnp.all(jnp.isfinite(q2)))
    assert bool(jnp.all(jnp.isfinite(reg)))
    assert bool(jnp.allclose(q1, rq1, rtol=5e-3, atol=5e-3))
    assert bool(jnp.allclose(q2, rq2, rtol=5e-3, atol=5e-3))
    assert bool(jnp.allclose(reg, rreg, rtol=5e-3, atol=5e-3))
    print("KERNEL_OK")
</pallas_src>

<mosaic_0001>
module attributes {stable_mosaic.version = 11 : i64} {
  func.func @_qnet_kernel(%arg0: memref<8x22xf32, #tpu.memory_space<vmem>>, %arg1: memref<8x4xf32, #tpu.memory_space<vmem>>, %arg2: memref<22x64xf32, #tpu.memory_space<vmem>>, %arg3: memref<4x64xf32, #tpu.memory_space<vmem>>, %arg4: memref<4x64x64xf32, #tpu.memory_space<vmem>>, %arg5: memref<5x64xf32, #tpu.memory_space<vmem>>, %arg6: memref<64x256xf32, #tpu.memory_space<vmem>>, %arg7: memref<2x256xf32, #tpu.memory_space<vmem>>, %arg8: memref<256x256xf32, #tpu.memory_space<vmem>>, %arg9: memref<256x512xf32, #tpu.memory_space<vmem>>, %arg10: memref<22x64xf32, #tpu.memory_space<vmem>>, %arg11: memref<64x2xf32, #tpu.memory_space<vmem>>, %arg12: memref<1x2xf32, #tpu.memory_space<vmem>>, %arg13: memref<256x8xf32, #tpu.memory_space<vmem>>, %arg14: memref<8x256xf32, #tpu.memory_space<vmem>>, %arg15: memref<256x64xf32, #tpu.memory_space<vmem>>, %arg16: memref<64x256xf32, #tpu.memory_space<vmem>>, %arg17: memref<8x1xf32, #tpu.memory_space<vmem>>, %arg18: memref<8x1xf32, #tpu.memory_space<vmem>>, %arg19: memref<8x1xf32, #tpu.memory_space<vmem>>) attributes {dimension_semantics = [], scalar_prefetch = 0 : i64, scratch_operands = 0 : i64, tpu.core_type = #tpu.core_type<tc>} {
    %c0 = arith.constant 0 : index
    %c0_0 = arith.constant 0 : index
    %0 = vector.load %arg0[%c0, %c0_0] : memref<8x22xf32, #tpu.memory_space<vmem>>, vector<8x22xf32>
    %c0_1 = arith.constant 0 : index
    %c0_2 = arith.constant 0 : index
    %1 = vector.load %arg1[%c0_1, %c0_2] : memref<8x4xf32, #tpu.memory_space<vmem>>, vector<8x4xf32>
    %c0_3 = arith.constant 0 : index
    %c0_4 = arith.constant 0 : index
    %2 = vector.load %arg5[%c0_3, %c0_4] : memref<5x64xf32, #tpu.memory_space<vmem>>, vector<5x64xf32>
    %c0_5 = arith.constant 0 : index
    %c0_6 = arith.constant 0 : index
    %3 = vector.load %arg2[%c0_5, %c0_6] : memref<22x64xf32, #tpu.memory_space<vmem>>, vector<22x64xf32>
    %cst = arith.constant dense<0.000000e+00> : vector<8x64xf32>
    %4 = tpu.matmul %0, %3, %cst {dimension_numbers = #tpu.dot_dimension_numbers<[1], [0], [0], [1], [0, 0, 1, 1], [], []>} : vector<8x22xf32>, vector<22x64xf32>, vector<8x64xf32> -> vector<8x64xf32>
    %c0_7 = arith.constant 0 : index
    %c0_8 = arith.constant 0 : index
    %5 = vector.load %arg3[%c0_7, %c0_8] : memref<4x64xf32, #tpu.memory_space<vmem>>, vector<4x64xf32>
    %cst_9 = arith.constant dense<0.000000e+00> : vector<8x64xf32>
    %6 = tpu.matmul %1, %5, %cst_9 {dimension_numbers = #tpu.dot_dimension_numbers<[1], [0], [0], [1], [0, 0, 1, 1], [], []>} : vector<8x4xf32>, vector<4x64xf32>, vector<8x64xf32> -> vector<8x64xf32>
    %7 = arith.addf %4, %6 : vector<8x64xf32>
    %8 = vector.extract_strided_slice %2 {offsets = [0, 0], sizes = [1, 64], strides = [1, 1]} : vector<5x64xf32> to vector<1x64xf32>
    %9 = vector.broadcast %8 : vector<1x64xf32> to vector<8x64xf32>
    %10 = arith.addf %7, %9 : vector<8x64xf32>
    %cst_10 = arith.constant 0.000000e+00 : f32
    %11 = vector.broadcast %cst_10 : f32 to vector<8x64xf32>
    %12 = arith.maximumf %10, %11 : vector<8x64xf32>
    %c0_11 = arith.constant 0 : index
    %c0_12 = arith.constant 0 : index
    %c0_13 = arith.constant 0 : index
    %13 = vector.load %arg4[%c0_11, %c0_12, %c0_13] : memref<4x64x64xf32, #tpu.memory_space<vmem>>, vector<1x64x64xf32>
    %14 = vector.shape_cast %13 : vector<1x64x64xf32> to vector<64x64xf32>
    %cst_14 = arith.constant dense<0.000000e+00> : vector<8x64xf32>
    %15 = tpu.matmul %12, %14, %cst_14 {dimension_numbers = #tpu.dot_dimension_numbers<[1], [0], [0], [1], [0, 0, 1, 1], [], []>} : vector<8x64xf32>, vector<64x64xf32>, vector<8x64xf32> -> vector<8x64xf32>
    %16 = vector.extract_strided_slice %2 {offsets = [1, 0], sizes = [1, 64], strides = [1, 1]} : vector<5x64xf32> to vector<1x64xf32>
    %17 = vector.broadcast %16 : vector<1x64xf32> to vector<8x64xf32>
    %18 = arith.addf %15, %17 : vector<8x64xf32>
    %cst_15 = arith.constant 0.000000e+00 : f32
    %19 = vector.broadcast %cst_15 : f32 to vector<8x64xf32>
    %20 = arith.maximumf %18, %19 : vector<8x64xf32>
    %c1 = arith.constant 1 : index
    %c0_16 = arith.constant 0 : index
    %c0_17 = arith.constant 0 : index
    %21 = vector.load %arg4[%c1, %c0_16, %c0_17] : memref<4x64x64xf32, #tpu.memory_space<vmem>>, vector<1x64x64xf32>
    %22 = vector.shape_cast %21 : vector<1x64x64xf32> to vector<64x64xf32>
    %cst_18 = arith.constant dense<0.000000e+00> : vector<8x64xf32>
    %23 = tpu.matmul %20, %22, %cst_18 {dimension_numbers = #tpu.dot_dimension_numbers<[1], [0], [0], [1], [0, 0, 1, 1], [], []>} : vector<8x64xf32>, vector<64x64xf32>, vector<8x64xf32> -> vector<8x64xf32>
    %24 = vector.extract_strided_slice %2 {offsets = [2, 0], sizes = [1, 64], strides = [1, 1]} : vector<5x64xf32> to vector<1x64xf32>
    %25 = vector.broadcast %24 : vector<1x64xf32> to vector<8x64xf32>
    %26 = arith.addf %23, %25 : vector<8x64xf32>
    %cst_19 = arith.constant 0.000000e+00 : f32
    %27 = vector.broadcast %cst_19 : f32 to vector<8x64xf32>
    %28 = arith.maximumf %26, %27 : vector<8x64xf32>
    %c0_20 = arith.constant 0 : index
    %c0_21 = arith.constant 0 : index
    %29 = vector.load %arg6[%c0_20, %c0_21] : memref<64x256xf32, #tpu.memory_space<vmem>>, vector<64x256xf32>
    %cst_22 = arith.constant dense<0.000000e+00> : vector<8x256xf32>
    %30 = tpu.matmul %28, %29, %cst_22 {dimension_numbers = #tpu.dot_dimension_numbers<[1], [0], [0], [1], [0, 0, 1, 1], [], []>} : vector<8x64xf32>, vector<64x256xf32>, vector<8x256xf32> -> vector<8x256xf32>
    %c0_23 = arith.constant 0 : index
    %c0_24 = arith.constant 0 : index
    %31 = vector.load %arg7[%c0_23, %c0_24] : memref<2x256xf32, #tpu.memory_space<vmem>>, vector<1x256xf32>
    %32 = vector.broadcast %31 : vector<1x256xf32> to vector<8x256xf32>
    %33 = arith.addf %30, %32 : vector<8x256xf32>
    %cst_25 = arith.constant 0.000000e+00 : f32
    %34 = vector.broadcast %cst_25 : f32 to vector<8x256xf32>
    %35 = arith.maximumf %33, %34 : vector<8x256xf32>
    %c0_26 = arith.constant 0 : index
    %c0_27 = arith.constant 0 : index
    %36 = vector.load %arg8[%c0_26, %c0_27] : memref<256x256xf32, #tpu.memory_space<vmem>>, vector<256x256xf32>
    %cst_28 = arith.constant dense<0.000000e+00> : vector<8x256xf32>
    %37 = tpu.matmul %35, %36, %cst_28 {dimension_numbers = #tpu.dot_dimension_numbers<[1], [0], [0], [1], [0, 0, 1, 1], [], []>} : vector<8x256xf32>, vector<256x256xf32>, vector<8x256xf32> -> vector<8x256xf32>
    %c1_29 = arith.constant 1 : index
    %c0_30 = arith.constant 0 : index
    %38 = vector.load %arg7[%c1_29, %c0_30] : memref<2x256xf32, #tpu.memory_space<vmem>>, vector<1x256xf32>
    %39 = vector.broadcast %38 : vector<1x256xf32> to vector<8x256xf32>
    %40 = arith.addf %37, %39 : vector<8x256xf32>
    %cst_31 = arith.constant 0.000000e+00 : f32
    %41 = vector.broadcast %cst_31 : f32 to vector<8x256xf32>
    %42 = arith.maximumf %40, %41 : vector<8x256xf32>
    %c0_32 = arith.constant 0 : index
    %c0_33 = arith.constant 0 : index
    %43 = vector.load %arg9[%c0_32, %c0_33] : memref<256x512xf32, #tpu.memory_space<vmem>>, vector<256x512xf32>
    %cst_34 = arith.constant dense<0.000000e+00> : vector<8x512xf32>
    %44 = tpu.matmul %42, %43, %cst_34 {dimension_numbers = #tpu.dot_dimension_numbers<[1], [0], [0], [1], [0, 0, 1, 1], [], []>} : vector<8x256xf32>, vector<256x512xf32>, vector<8x512xf32> -> vector<8x512xf32>
    %45 = vector.extract_strided_slice %44 {offsets = [0, 0], sizes = [8, 256], strides = [1, 1]} : vector<8x512xf32> to vector<8x256xf32>
    %46 = vector.extract_strided_slice %44 {offsets = [0, 256], sizes = [8, 256], strides = [1, 1]} : vector<8x512xf32> to vector<8x256xf32>
    %c0_35 = arith.constant 0 : index
    %c0_36 = arith.constant 0 : index
    %47 = vector.load %arg13[%c0_35, %c0_36] : memref<256x8xf32, #tpu.memory_space<vmem>>, vector<256x8xf32>
    %c0_37 = arith.constant 0 : index
    %c0_38 = arith.constant 0 : index
    %48 = vector.load %arg14[%c0_37, %c0_38] : memref<8x256xf32, #tpu.memory_space<vmem>>, vector<8x256xf32>
    %c0_39 = arith.constant 0 : index
    %c0_40 = arith.constant 0 : index
    %49 = vector.load %arg15[%c0_39, %c0_40] : memref<256x64xf32, #tpu.memory_space<vmem>>, vector<256x64xf32>
    %c0_41 = arith.constant 0 : index
    %c0_42 = arith.constant 0 : index
    %50 = vector.load %arg16[%c0_41, %c0_42] : memref<64x256xf32, #tpu.memory_space<vmem>>, vector<64x256xf32>
    %51 = arith.mulf %46, %46 : vector<8x256xf32>
    %cst_43 = arith.constant dense<0.000000e+00> : vector<8x8xf32>
    %52 = tpu.matmul %51, %47, %cst_43 {dimension_numbers = #tpu.dot_dimension_numbers<[1], [0], [0], [1], [0, 0, 1, 1], [], []>} : vector<8x256xf32>, vector<256x8xf32>, vector<8x8xf32> -> vector<8x8xf32>
    %cst_44 = arith.constant 1.000000e-24 : f32
    %53 = vector.broadcast %cst_44 : f32 to vector<8x8xf32>
    %54 = arith.maximumf %52, %53 : vector<8x8xf32>
    %55 = math.rsqrt %54 : vector<8x8xf32>
    %cst_45 = arith.constant dense<0.000000e+00> : vector<8x256xf32>
    %56 = tpu.matmul %55, %48, %cst_45 {dimension_numbers = #tpu.dot_dimension_numbers<[1], [0], [0], [1], [0, 0, 1, 1], [], []>} : vector<8x8xf32>, vector<8x256xf32>, vector<8x256xf32> -> vector<8x256xf32>
    %57 = arith.mulf %46, %56 : vector<8x256xf32>
    %cst_46 = arith.constant dense<0.000000e+00> : vector<8x64xf32>
    %58 = tpu.matmul %57, %49, %cst_46 {dimension_numbers = #tpu.dot_dimension_numbers<[1], [0], [0], [1], [0, 0, 1, 1], [], []>} : vector<8x256xf32>, vector<256x64xf32>, vector<8x64xf32> -> vector<8x64xf32>
    %59 = arith.mulf %58, %58 : vector<8x64xf32>
    %60 = vector.shape_cast %59 : vector<8x64xf32> to vector<1x8x64xf32>
    %cst_47 = arith.constant dense<0.000000e+00> : vector<1xf32>
    %61 = vector.multi_reduction <add>, %60, %cst_47 [1, 2] : vector<1x8x64xf32> to vector<1xf32>
    %62 = vector.shape_cast %61 : vector<1xf32> to vector<1x1x1xf32>
    %63 = vector.extract %62[0, 0, 0] : f32 from vector<1x1x1xf32>
    %64 = arith.mulf %57, %57 : vector<8x256xf32>
    %65 = vector.shape_cast %64 : vector<8x256xf32> to vector<1x8x256xf32>
    %cst_48 = arith.constant dense<0.000000e+00> : vector<1xf32>
    %66 = vector.multi_reduction <add>, %65, %cst_48 [1, 2] : vector<1x8x256xf32> to vector<1xf32>
    %67 = vector.shape_cast %66 : vector<1xf32> to vector<1x1x1xf32>
    %68 = vector.extract %67[0, 0, 0] : f32 from vector<1x1x1xf32>
    %69 = arith.subf %63, %68 : f32
    %cst_49 = arith.constant 5.000000e-01 : f32
    %70 = arith.mulf %cst_49, %69 : f32
    %cst_50 = arith.constant 0.020833334 : f32
    %71 = arith.mulf %70, %cst_50 : f32
    %c0_51 = arith.constant 0 : index
    %c0_52 = arith.constant 0 : index
    %72 = vector.load %arg10[%c0_51, %c0_52] : memref<22x64xf32, #tpu.memory_space<vmem>>, vector<22x64xf32>
    %cst_53 = arith.constant dense<0.000000e+00> : vector<8x64xf32>
    %73 = tpu.matmul %0, %72, %cst_53 {dimension_numbers = #tpu.dot_dimension_numbers<[1], [0], [0], [1], [0, 0, 1, 1], [], []>} : vector<8x22xf32>, vector<22x64xf32>, vector<8x64xf32> -> vector<8x64xf32>
    %cst_54 = arith.constant dense<0.000000e+00> : vector<8x256xf32>
    %74 = tpu.matmul %73, %50, %cst_54 {dimension_numbers = #tpu.dot_dimension_numbers<[1], [0], [0], [1], [0, 0, 1, 1], [], []>} : vector<8x64xf32>, vector<64x256xf32>, vector<8x256xf32> -> vector<8x256xf32>
    %75 = arith.mulf %45, %74 : vector<8x256xf32>
    %cst_55 = arith.constant dense<0.000000e+00> : vector<8x8xf32>
    %76 = tpu.matmul %75, %47, %cst_55 {dimension_numbers = #tpu.dot_dimension_numbers<[1], [0], [0], [1], [0, 0, 1, 1], [], []>} : vector<8x256xf32>, vector<256x8xf32>, vector<8x8xf32> -> vector<8x8xf32>
    %77 = tpu.iota {dimensions = array<i32: 1>} : vector<8x8xi32>
    %c4_i32 = arith.constant 4 : i32
    %78 = vector.broadcast %c4_i32 : i32 to vector<8x8xi32>
    %79 = arith.cmpi slt, %77, %78 : vector<8x8xi32>
    %cst_56 = arith.constant -1.000000e+30 : f32
    %80 = vector.broadcast %cst_56 : f32 to vector<8x8xf32>
    %81 = arith.select %79, %76, %80 : vector<8x8xi1>, vector<8x8xf32>
    %cst_57 = arith.constant dense<0xFF800000> : vector<8xf32>
    %82 = vector.multi_reduction <maximumf>, %81, %cst_57 [1] : vector<8x8xf32> to vector<8xf32>
    %83 = vector.shape_cast %82 : vector<8xf32> to vector<8x1xf32>
    %cst_58 = arith.constant -1.000000e+30 : f32
    %84 = vector.broadcast %cst_58 : f32 to vector<8x8xf32>
    %85 = arith.select %79, %84, %76 : vector<8x8xi1>, vector<8x8xf32>
    %cst_59 = arith.constant dense<0xFF800000> : vector<8xf32>
    %86 = vector.multi_reduction <maximumf>, %85, %cst_59 [1] : vector<8x8xf32> to vector<8xf32>
    %87 = vector.shape_cast %86 : vector<8xf32> to vector<8x1xf32>
    %88 = vector.shape_cast %83 : vector<8x1xf32> to vector<8x1xf32>
    %89 = vector.broadcast %88 : vector<8x1xf32> to vector<8x8xf32>
    %90 = vector.shape_cast %87 : vector<8x1xf32> to vector<8x1xf32>
    %91 = vector.broadcast %90 : vector<8x1xf32> to vector<8x8xf32>
    %92 = arith.select %79, %89, %91 : vector<8x8xi1>, vector<8x8xf32>
    %93 = arith.subf %76, %92 : vector<8x8xf32>
    %94 = math.exp %93 : vector<8x8xf32>
    %cst_60 = arith.constant 0.000000e+00 : f32
    %95 = vector.broadcast %cst_60 : f32 to vector<8x8xf32>
    %96 = arith.select %79, %94, %95 : vector<8x8xi1>, vector<8x8xf32>
    %cst_61 = arith.constant dense<0.000000e+00> : vector<8xf32>
    %97 = vector.multi_reduction <add>, %96, %cst_61 [1] : vector<8x8xf32> to vector<8xf32>
    %98 = vector.shape_cast %97 : vector<8xf32> to vector<8x1xf32>
    %cst_62 = arith.constant 0.000000e+00 : f32
    %99 = vector.broadcast %cst_62 : f32 to vector<8x8xf32>
    %100 = arith.select %79, %99, %94 : vector<8x8xi1>, vector<8x8xf32>
    %cst_63 = arith.constant dense<0.000000e+00> : vector<8xf32>
    %101 = vector.multi_reduction <add>, %100, %cst_63 [1] : vector<8x8xf32> to vector<8xf32>
    %102 = vector.shape_cast %101 : vector<8xf32> to vector<8x1xf32>
    %103 = vector.shape_cast %98 : vector<8x1xf32> to vector<8x1xf32>
    %104 = vector.broadcast %103 : vector<8x1xf32> to vector<8x8xf32>
    %105 = vector.shape_cast %102 : vector<8x1xf32> to vector<8x1xf32>
    %106 = vector.broadcast %105 : vector<8x1xf32> to vector<8x8xf32>
    %107 = arith.select %79, %104, %106 : vector<8x8xi1>, vector<8x8xf32>
    %108 = arith.divf %94, %107 : vector<8x8xf32>
    %cst_64 = arith.constant dense<0.000000e+00> : vector<8x256xf32>
    %109 = tpu.matmul %108, %48, %cst_64 {dimension_numbers = #tpu.dot_dimension_numbers<[1], [0], [0], [1], [0, 0, 1, 1], [], []>} : vector<8x8xf32>, vector<8x256xf32>, vector<8x256xf32> -> vector<8x256xf32>
    %110 = arith.mulf %109, %46 : vector<8x256xf32>
    %cst_65 = arith.constant dense<0.000000e+00> : vector<8x64xf32>
    %111 = tpu.matmul %110, %49, %cst_65 {dimension_numbers = #tpu.dot_dimension_numbers<[1], [0], [0], [1], [0, 0, 1, 1], [], []>} : vector<8x256xf32>, vector<256x64xf32>, vector<8x64xf32> -> vector<8x64xf32>
    %cst_66 = arith.constant 9.99999997E-7 : f32
    %112 = vector.broadcast %cst_66 : f32 to vector<8x8xf32>
    %113 = arith.addf %108, %112 : vector<8x8xf32>
    %114 = math.log %113 : vector<8x8xf32>
    %cst_67 = arith.constant dense<0.000000e+00> : vector<8xf32>
    %115 = vector.multi_reduction <add>, %114, %cst_67 [1] : vector<8x8xf32> to vector<8xf32>
    %116 = vector.shape_cast %115 : vector<8xf32> to vector<8x1xf32>
    %cst_68 = arith.constant -2.500000e-03 : f32
    %117 = vector.broadcast %cst_68 : f32 to vector<8x1xf32>
    %118 = arith.mulf %117, %116 : vector<8x1xf32>
    %cst_69 = arith.constant 0.00999999977 : f32
    %119 = arith.mulf %cst_69, %71 : f32
    %120 = vector.broadcast %119 : f32 to vector<8x1xf32>
    %121 = arith.addf %118, %120 : vector<8x1xf32>
    %c2 = arith.constant 2 : index
    %c0_70 = arith.constant 0 : index
    %c0_71 = arith.constant 0 : index
    %122 = vector.load %arg4[%c2, %c0_70, %c0_71] : memref<4x64x64xf32, #tpu.memory_space<vmem>>, vector<1x64x64xf32>
    %123 = vector.shape_cast %122 : vector<1x64x64xf32> to vector<64x64xf32>
    %cst_72 = arith.constant dense<0.000000e+00> : vector<8x64xf32>
    %124 = tpu.matmul %111, %123, %cst_72 {dimension_numbers = #tpu.dot_dimension_numbers<[1], [0], [0], [1], [0, 0, 1, 1], [], []>} : vector<8x64xf32>, vector<64x64xf32>, vector<8x64xf32> -> vector<8x64xf32>
    %125 = vector.extract_strided_slice %2 {offsets = [3, 0], sizes = [1, 64], strides = [1, 1]} : vector<5x64xf32> to vector<1x64xf32>
    %126 = vector.broadcast %125 : vector<1x64xf32> to vector<8x64xf32>
    %127 = arith.addf %124, %126 : vector<8x64xf32>
    %cst_73 = arith.constant 0.000000e+00 : f32
    %128 = vector.broadcast %cst_73 : f32 to vector<8x64xf32>
    %129 = arith.maximumf %127, %128 : vector<8x64xf32>
    %c3 = arith.constant 3 : index
    %c0_74 = arith.constant 0 : index
    %c0_75 = arith.constant 0 : index
    %130 = vector.load %arg4[%c3, %c0_74, %c0_75] : memref<4x64x64xf32, #tpu.memory_space<vmem>>, vector<1x64x64xf32>
    %131 = vector.shape_cast %130 : vector<1x64x64xf32> to vector<64x64xf32>
    %cst_76 = arith.constant dense<0.000000e+00> : vector<8x64xf32>
    %132 = tpu.matmul %129, %131, %cst_76 {dimension_numbers = #tpu.dot_dimension_numbers<[1], [0], [0], [1], [0, 0, 1, 1], [], []>} : vector<8x64xf32>, vector<64x64xf32>, vector<8x64xf32> -> vector<8x64xf32>
    %133 = vector.extract_strided_slice %2 {offsets = [4, 0], sizes = [1, 64], strides = [1, 1]} : vector<5x64xf32> to vector<1x64xf32>
    %134 = vector.broadcast %133 : vector<1x64xf32> to vector<8x64xf32>
    %135 = arith.addf %132, %134 : vector<8x64xf32>
    %cst_77 = arith.constant 0.000000e+00 : f32
    %136 = vector.broadcast %cst_77 : f32 to vector<8x64xf32>
    %137 = arith.maximumf %135, %136 : vector<8x64xf32>
    %c0_78 = arith.constant 0 : index
    %c0_79 = arith.constant 0 : index
    %138 = vector.load %arg11[%c0_78, %c0_79] : memref<64x2xf32, #tpu.memory_space<vmem>>, vector<64x2xf32>
    %cst_80 = arith.constant dense<0.000000e+00> : vector<8x2xf32>
    %139 = tpu.matmul %137, %138, %cst_80 {dimension_numbers = #tpu.dot_dimension_numbers<[1], [0], [0], [1], [0, 0, 1, 1], [], []>} : vector<8x64xf32>, vector<64x2xf32>, vector<8x2xf32> -> vector<8x2xf32>
    %c0_81 = arith.constant 0 : index
    %c0_82 = arith.constant 0 : index
    %140 = vector.load %arg12[%c0_81, %c0_82] : memref<1x2xf32, #tpu.memory_space<vmem>>, vector<1x2xf32>
    %141 = vector.broadcast %140 : vector<1x2xf32> to vector<8x2xf32>
    %142 = arith.addf %139, %141 : vector<8x2xf32>
    %143 = vector.extract_strided_slice %142 {offsets = [0, 0], sizes = [8, 1], strides = [1, 1]} : vector<8x2xf32> to vector<8x1xf32>
    %c0_83 = arith.constant 0 : index
    %c0_84 = arith.constant 0 : index
    %144 = vector.load %arg17[%c0_83, %c0_84] : memref<8x1xf32, #tpu.memory_space<vmem>>, vector<8x1xf32>
    tpu.vector_store %arg17[%c0_83, %c0_84], %143 {strides = array<i32>} : memref<8x1xf32, #tpu.memory_space<vmem>>, vector<8x1xf32>,
    %145 = vector.extract_strided_slice %142 {offsets = [0, 1], sizes = [8, 1], strides = [1, 1]} : vector<8x2xf32> to vector<8x1xf32>
    %c0_85 = arith.constant 0 : index
    %c0_86 = arith.constant 0 : index
    %146 = vector.load %arg18[%c0_85, %c0_86] : memref<8x1xf32, #tpu.memory_space<vmem>>, vector<8x1xf32>
    tpu.vector_store %arg18[%c0_85, %c0_86], %145 {strides = array<i32>} : memref<8x1xf32, #tpu.memory_space<vmem>>, vector<8x1xf32>,
    %c0_87 = arith.constant 0 : index
    %c0_88 = arith.constant 0 : index
    %147 = vector.load %arg19[%c0_87, %c0_88] : memref<8x1xf32, #tpu.memory_space<vmem>>, vector<8x1xf32>
    tpu.vector_store %arg19[%c0_87, %c0_88], %121 {strides = array<i32>} : memref<8x1xf32, #tpu.memory_space<vmem>>, vector<8x1xf32>,
    return
  }
}

</mosaic_0001>

<bundles_post_ra>
// kernel: qnetwork_forward.1
= control target key start
LH: loop header
LB: loop body
LE: loop exit
PB: predicated region body
PF: predicated region fallthrough
CT: control target
= control target key end

     0   :  { %s2471_s0 = inlined_call_operand.vmem [shape: f32[8,22], index: 0, kind: input, shape index: {}]   ;;  %s2472_s1 = inlined_call_operand.vmem [shape: f32[8,4], index: 1, kind: input, shape index: {}]   ;;  %s2473_s2 = inlined_call_operand.vmem [shape: f32[22,64], index: 2, kind: input, shape index: {}]   ;;  %s2474_s3 = inlined_call_operand.vmem [shape: f32[4,64], index: 3, kind: input, shape index: {}]   ;;  %s2475_s4 = inlined_call_operand.hbm [shape: f32[4,64,64], index: 4, kind: input, shape index: {}]   ;;  %s2476_s5 = inlined_call_operand.hbm [shape: f32[5,64], index: 5, kind: input, shape index: {}]   ;;  %s2477_s6 = inlined_call_operand.vmem [shape: f32[64,256], index: 6, kind: input, shape index: {}]   ;;  %s2478_s7 = inlined_call_operand.hbm [shape: f32[2,256], index: 7, kind: input, shape index: {}]   ;;  %s2479_s8 = inlined_call_operand.vmem [shape: f32[256,256], index: 8, kind: input, shape index: {}]   ;;  %s2480_s9 = inlined_call_operand.hbm [shape: f32[256,512], index: 9, kind: input, shape index: {}]   ;;  %s2481_s10 = inlined_call_operand.vmem [shape: f32[22,64], index: 10, kind: input, shape index: {}]   ;;  %s2482_s11 = inlined_call_operand.vmem [shape: f32[64,2], index: 11, kind: input, shape index: {}]   ;;  %s2483_s12 = inlined_call_operand.hbm [shape: f32[1,2], index: 12, kind: input, shape index: {}]   ;;  %s2484_s13 = inlined_call_operand.vmem [shape: f32[256,8], index: 13, kind: input, shape index: {}]   ;;  %s2485_s14 = inlined_call_operand.vmem [shape: f32[8,256], index: 14, kind: input, shape index: {}]   ;;  %s2486_s15 = inlined_call_operand.vmem [shape: f32[256,64], index: 15, kind: input, shape index: {}]   ;;  %s2487_s16 = inlined_call_operand.hbm [shape: f32[64,256], index: 16, kind: input, shape index: {}]   ;;  %s2488_s17 = inlined_call_operand.vmem [shape: f32[8,1], index: 17, kind: output, shape index: {0}]   ;;  %s2489_s18 = inlined_call_operand.vmem [shape: f32[8,1], index: 18, kind: output, shape index: {1}]   ;;  %s2490_s19 = inlined_call_operand.vmem [shape: f32[8,1], index: 19, kind: output, shape index: {2}]  }
   0x1   :  { %2493 = sst [smem:[#allocation16_spill]] %s2471_s0 }
   0x2   :  { %2494 = sst [smem:[#allocation17_spill]] %s2472_s1 }
   0x3   :  { %2495 = sst [smem:[#allocation18_spill]] %s2473_s2 }
   0x4   :  { %2496 = sst [smem:[#allocation19_spill]] %s2474_s3 }
   0x5   :  { %25 = vsyncpa [#allocation3], 0 }
   0x6   :  { %26 = vsyncpa [#allocation5], 0 }
   0x7   :  { %27 = vsyncpa [#allocation8], 0  ;;  %s55_s20 = sshll.u32 %s2476_s5, 4  ;;  %s56_s20 = int_to_ptr.hbm [resolvable:$true] %s55_s20 }
   0x8   :  { %28 = vsyncpa [#allocation11], 0  ;;  %s1607_s21 = smov [#allocation4]   ;;  %s80_s23 = sshll.u32 %s2480_s9, 4  ;;  %s81_s23 = int_to_ptr.hbm [resolvable:$true] %s80_s23 }
   0x9   :  { %s57_s1 = sshll.u32 %s1607_s21, 4  ;;  %s1608_s24 = smov [#allocation7]   ;;  %s58_s1 = int_to_ptr.vmem [resolvable:$true] %s57_s1 }
   0xa   :  { %60 = dma.hbm_to_vmem [thread:$0]  %s56_s20, 128, %s58_s1, [#allocation5]  }
   0xb   :  { %s82_s25 = sshll.u32 %s1608_s24, 4  ;;  %s1609_s3 = smov 512   ;;  %s83_s25 = int_to_ptr.vmem [resolvable:$true] %s82_s25 }
   0xc   :  { %s1610_s26 = smov 32   ;;  %s41_s5 = sshll.u32 %s2475_s4, 4  ;;  %s42_s5 = int_to_ptr.hbm [resolvable:$true] %s41_s5 }
   0xd   :  { %88 = dma.hbm_to_vmem [thread:$0]  %s81_s23, 16384, %s83_s25, [#allocation8], %s1609_s3, %s1609_s3, %s1610_s26  }
   0xe   :  { %s1611_s29 = smov [#allocation2]   ;;  %s68_s9 = sshll.u32 %s2478_s7, 4  ;;  %s69_s9 = int_to_ptr.hbm [resolvable:$true] %s68_s9 }
   0xf   :  { %s43_s0 = sshll.u32 %s1611_s29, 4  ;;  %s1612_s20 = smov 128   ;;  %s44_s0 = int_to_ptr.vmem [resolvable:$true] %s43_s0 }
  0x10   :  { %s1613_s1 = smov 8   ;;  %s1614_s22 = smov [#allocation6]  }
  0x11   :  { %49 = dma.hbm_to_vmem [thread:$0]  %s42_s5, 4096, %s44_s0, [#allocation3], %s1612_s20, %s1612_s20, %s1613_s1  }
  0x12   :  { %s70_s2 = sshll.u32 %s1614_s22, 4  ;;  %s98_s25 = sshll.u32 %s2483_s12, 4  ;;  %s71_s2 = int_to_ptr.vmem [resolvable:$true] %s70_s2  ;;  %s99_s25 = int_to_ptr.hbm [resolvable:$true] %s98_s25 }
  0x13   :  { %73 = dma.hbm_to_vmem [thread:$0]  %s69_s9, 64, %s71_s2, [#allocation5]  }
  0x14   :  { %s114_s26 = sshll.u32 %s2487_s16, 4  ;;  %s1615_s27 = smov [#allocation9]   ;;  %s115_s26 = int_to_ptr.hbm [resolvable:$true] %s114_s26 }
  0x15   :  { %s100_s28 = sshll.u32 %s1615_s27, 4  ;;  %s1616_s7 = smov [#allocation10]   ;;  %s101_s28 = int_to_ptr.vmem [resolvable:$true] %s100_s28 }
  0x16   :  { %103 = dma.hbm_to_vmem [thread:$0]  %s99_s25, 16, %s101_s28, [#allocation8]  }
  0x17   :  { %s116_s5 = sshll.u32 %s1616_s7, 4  ;;  %s1617_s29 = smov 256   ;;  %s117_s5 = int_to_ptr.vmem [resolvable:$true] %s116_s5 }
  0x18   :  { %s1618_s0 = smov 16  }
  0x19   :  { %122 = dma.hbm_to_vmem [thread:$0]  %s115_s26, 2048, %s117_s5, [#allocation11], %s1617_s29, %s1617_s29, %s1618_s0  }
  0x1a   :  { %1599 = dma.done.wait [#allocation3], 4096  }
  0x1b   :  { %1600 = vsyncadd [#allocation3], 4294963200 }
  0x1c   :  { %1601 = dma.done.wait [#allocation5], 192  }
  0x1d   :  { %1602 = vsyncadd [#allocation5], 4294967104 }
  0x1e   :  { %1603 = dma.done.wait [#allocation8], 16400  }
  0x1f   :  { %1604 = vsyncadd [#allocation8], 4294950896 }
  0x20   :  { %1605 = dma.done.wait [#allocation11], 2048  }
  0x21   :  { %1606 = vsyncadd [#allocation11], 4294965248  ;;  %vm186_vm0 = vcmask 1045504   ;;  %vm158_vm1 = vcmask 1043456   ;;  %vm154_vm2 = vcmask 31744   ;;  %s2497_s30 = sld [smem:[#allocation18_spill]] }
  0x22   :  { %s2498_s22 = sld [smem:[#allocation19_spill]]  ;;  %v220_v5 = vld [vmem:[#allocation2 + $0x38] sm:$0xff]  ;;  %v219_v6 = vld [vmem:[#allocation2 + $0x30] sm:$0xff]  ;;  %vm182_vm3 = vcmask 179200   ;;  %v218_v8 = vld [vmem:[#allocation2 + $0x28] sm:$0xff]  ;;  %vm222_vm4 = vcmask 523264  }
  0x23   :  { %s2499_s23 = sld [smem:[#allocation17_spill]]  ;;  %234 = vmatpush.msra.mxu2 %v220_v5  ;;  %v217_v9 = vld [vmem:[#allocation2 + $0x20] sm:$0xff]  ;;  %v216_v10 = vld [vmem:[#allocation2 + $0x18] sm:$0xff]  ;;  %v215_v11 = vld [vmem:[#allocation2 + $0x10] sm:$0xff]  ;;  %vm924_vm7 = vcmask 64512   ;;  %vm1384_vm14 = vcmask 7168  }
  0x24   :  { %s2500_s27 = sld [smem:[#allocation16_spill]]  ;;  %v214_v12 = vld [vmem:[#allocation2 + $0x8] sm:$0xff]  ;;  %v213_v13 = vld [vmem:[#allocation2] sm:$0xff]  ;;  %v255_v14 = vld [vmem:[#allocation2 + $0x78] sm:$0xff]  ;;  %s1619_s16 = smov 127  }
  0x25   :  { %235 = vmatpush.msra.mxu2 %v219_v6  ;;  %v254_v15 = vld [vmem:[#allocation2 + $0x70] sm:$0xff]  ;;  %268 = vmatpush.msra.mxu3 %v255_v14  ;;  %v253_v16 = vld [vmem:[#allocation2 + $0x68] sm:$0xff]  ;;  %v252_v17 = vld [vmem:[#allocation2 + $0x60] sm:$0xff] }
  0x26   :  { %v251_v18 = vld [vmem:[#allocation2 + $0x58] sm:$0xff]  ;;  %v1758_v19 = vld [vmem:[#allocation4] sm:$0x1f]  ;;  %v250_v26 = vld [vmem:[#allocation2 + $0x50] sm:$0xff] }
  0x27   :  { %v152_v0 = vld [vmem:[%s2497_s30 + $0x10] sm:$0x3f]  ;;  %v151_v1 = vld [vmem:[%s2497_s30 + $0x8] sm:$0xff]  ;;  %v150_v4 = vld [vmem:[%s2497_s30] sm:$0xff]  ;;  %236 = vmatpush.msra.mxu2 %v218_v8  ;;  %269 = vmatpush.msra.mxu3 %v254_v15  ;;  %v210_v21 = vperm.slane %v1758_v19, 0  ;;  %v221_v39 = vperm.slane %v1758_v19, 1 }
  0x28   :  { %v153_v2 = vld [vmem:[%s2498_s22] sm:$0xf]  ;;  %1410 = vmatpush.msk.msra.mxu1 %vm186_vm0, %v152_v0  ;;  %v249_v27 = vld [vmem:[#allocation2 + $0x48] sm:$0xff]  ;;  %v295_v29 = vld [vmem:[%s2477_s6 + $0x70] sm:$0xff] }
  0x29   :  { %1408 = vmatpush.msk.msra.mxu0 %vm158_vm1, %v153_v2  ;;  %v148_v3 = vld [vmem:[%s2499_s23] sm:$0xff]  ;;  %237 = vmatpush.msra.mxu2 %v217_v9  ;;  %v296_v30 = vld [vmem:[%s2477_s6 + $0x78] sm:$0xff]  ;;  %v294_v32 = vld [vmem:[%s2477_s6 + $0x68] sm:$0xff] }
  0x2a   :  { %1409 = vmatmul.msk.f32.vlgmr.msra.gmra.mxu0 %vm154_vm2, %v148_v3  ;;  %204 = vmatpush.msra.mxu1 %v151_v1  ;;  %v147_v7 = vld [vmem:[%s2500_s27] sm:$0xff]  ;;  %v291_v33 = vld [vmem:[%s2477_s6 + $0x50] sm:$0xff]  ;;  %v292_v34 = vld [vmem:[%s2477_s6 + $0x58] sm:$0xff] }
  0x2b   :  { %238 = vmatpush.msra.mxu2 %v216_v10  ;;  %270 = vmatpush.msra.mxu3 %v253_v16  ;;  %v248_v28 = vld [vmem:[#allocation2 + $0x40] sm:$0xff]  ;;  %v290_v36 = vld [vmem:[%s2477_s6 + $0x48] sm:$0xff]  ;;  %v287_v37 = vld [vmem:[%s2477_s6 + $0x30] sm:$0xff] }
  0x2c   :  { %205 = vmatpush.msra.mxu1 %v150_v4  ;;  %v293_v31 = vld [vmem:[%s2477_s6 + $0x60] sm:$0xff]  ;;  %314 = vmatpush.msrb.mxu0 %v295_v29  ;;  %v288_v38 = vld [vmem:[%s2477_s6 + $0x38] sm:$0xff]  ;;  %v286_v44 = vld [vmem:[%s2477_s6 + $0x28] sm:$0xff] }
  0x2d   :  { %1411 = vmatmul.msk.f32.vlgmr.msra.gmra.mxu1 %vm182_vm3, %v147_v7  ;;  %239 = vmatpush.msra.mxu2 %v215_v11  ;;  %v289_v35 = vld [vmem:[%s2477_s6 + $0x40] sm:$0xff]  ;;  %v283_v45 = vld [vmem:[%s2477_s6 + $0x10] sm:$0xff]  ;;  %v284_v46 = vld [vmem:[%s2477_s6 + $0x18] sm:$0xff] }
  0x2e   :  { %271 = vmatpush.msra.mxu3 %v252_v17  ;;  %334 = vmatpush.msrb.mxu1 %v296_v30  ;;  %v285_v43 = vld [vmem:[%s2477_s6 + $0x20] sm:$0xff]  ;;  %v282_v48 = vld [vmem:[%s2477_s6 + $0x8] sm:$0xff]  ;;  %v378_v49 = vld [vmem:[%s2479_s8 + $0xf0] sm:$0xff] }
  0x2f   :  { %240 = vmatpush.msra.mxu2 %v214_v12  ;;  %315 = vmatpush.msrb.mxu0 %v293_v31  ;;  %v281_v47 = vld [vmem:[%s2477_s6] sm:$0xff]  ;;  %v410_v50 = vld [vmem:[%s2479_s8 + $0x1f0] sm:$0xff]  ;;  %v379_v51 = vld [vmem:[%s2479_s8 + $0xf8] sm:$0xff] }
  0x30   :  { %272 = vmatpush.msra.mxu3 %v251_v18  ;;  %335 = vmatpush.msrb.mxu1 %v294_v32  ;;  %v411_v52 = vld [vmem:[%s2479_s8 + $0x1f8] sm:$0xff]  ;;  %v376_v53 = vld [vmem:[%s2479_s8 + $0xe0] sm:$0xff]  ;;  %v377_v55 = vld [vmem:[%s2479_s8 + $0xe8] sm:$0xff] }
  0x31   :  { %241 = vmatpush.msra.mxu2 %v213_v13  ;;  %316 = vmatpush.msrb.mxu0 %v291_v33  ;;  %v408_v54 = vld [vmem:[%s2479_s8 + $0x1e0] sm:$0xff]  ;;  %v409_v56 = vld [vmem:[%s2479_s8 + $0x1e8] sm:$0xff]  ;;  %v374_v57 = vld [vmem:[%s2479_s8 + $0xd0] sm:$0xff] }
  0x32   :  { %273 = vmatpush.msra.mxu3 %v250_v26  ;;  %336 = vmatpush.msrb.mxu1 %v292_v34  ;;  %v406_v58 = vld [vmem:[%s2479_s8 + $0x1d0] sm:$0xff]  ;;  %v375_v59 = vld [vmem:[%s2479_s8 + $0xd8] sm:$0xff]  ;;  %v372_v61 = vld [vmem:[%s2479_s8 + $0xc0] sm:$0xff] }
  0x33   :  { %317 = vmatpush.msrb.mxu0 %v289_v35  ;;  %419 = vmatpush.msrb.mxu2 %v378_v49  ;;  %v407_v60 = vld [vmem:[%s2479_s8 + $0x1d8] sm:$0xff]  ;;  %v404_v62 = vld [vmem:[%s2479_s8 + $0x1c0] sm:$0xff]  ;;  %v373_v63 = vld [vmem:[%s2479_s8 + $0xc8] sm:$0xff] }
  0x34   :  { %274 = vmatpush.msra.mxu3 %v249_v27  ;;  %337 = vmatpush.msrb.mxu1 %v290_v36  ;;  %v405_v0 = vld [vmem:[%s2479_s8 + $0x1c8] sm:$0xff]  ;;  %v370_v1 = vld [vmem:[%s2479_s8 + $0xb0] sm:$0xff]  ;;  %v371_v3 = vld [vmem:[%s2479_s8 + $0xb8] sm:$0xff] }
  0x35   :  { %318 = vmatpush.msrb.mxu0 %v287_v37  ;;  %420 = vmatpush.msrb.mxu2 %v376_v53  ;;  %v402_v2 = vld [vmem:[%s2479_s8 + $0x1b0] sm:$0xff]  ;;  %v403_v4 = vld [vmem:[%s2479_s8 + $0x1b8] sm:$0xff]  ;;  %v368_v5 = vld [vmem:[%s2479_s8 + $0xa0] sm:$0xff] }
  0x36   :  { %275 = vmatpush.msra.mxu3 %v248_v28  ;;  %338 = vmatpush.msrb.mxu1 %v288_v38  ;;  %v400_v6 = vld [vmem:[%s2479_s8 + $0x1a0] sm:$0xff]  ;;  %v369_v7 = vld [vmem:[%s2479_s8 + $0xa8] sm:$0xff]  ;;  %v366_v9 = vld [vmem:[%s2479_s8 + $0x90] sm:$0xff]  ;;  %v256_v38 = vperm.slane %v1758_v19, 2 }
  0x37   :  { %319 = vmatpush.msrb.mxu0 %v285_v43  ;;  %421 = vmatpush.msrb.mxu2 %v374_v57  ;;  %v401_v8 = vld [vmem:[%s2479_s8 + $0x1a8] sm:$0xff]  ;;  %v398_v10 = vld [vmem:[%s2479_s8 + $0x190] sm:$0xff]  ;;  %v367_v11 = vld [vmem:[%s2479_s8 + $0x98] sm:$0xff] }
  0x38   :  { %339 = vmatpush.msrb.mxu1 %v286_v44  ;;  %439 = vmatpush.msrb.mxu3 %v410_v50  ;;  %v399_v12 = vld [vmem:[%s2479_s8 + $0x198] sm:$0xff]  ;;  %v364_v13 = vld [vmem:[%s2479_s8 + $0x80] sm:$0xff]  ;;  %v365_v15 = vld [vmem:[%s2479_s8 + $0x88] sm:$0xff] }
  0x39   :  { %320 = vmatpush.msrb.mxu0 %v283_v45  ;;  %422 = vmatpush.msrb.mxu2 %v372_v61  ;;  %v396_v14 = vld [vmem:[%s2479_s8 + $0x180] sm:$0xff]  ;;  %v397_v16 = vld [vmem:[%s2479_s8 + $0x188] sm:$0xff]  ;;  %v362_v17 = vld [vmem:[%s2479_s8 + $0x70] sm:$0xff] }
  0x3a   :  { %340 = vmatpush.msrb.mxu1 %v284_v46  ;;  %440 = vmatpush.msrb.mxu3 %v408_v54  ;;  %v394_v18 = vld [vmem:[%s2479_s8 + $0x170] sm:$0xff]  ;;  %v359_v28 = vld [vmem:[%s2479_s8 + $0x58] sm:$0xff]  ;;  %v356_v30 = vld [vmem:[%s2479_s8 + $0x40] sm:$0xff] }
  0x3b   :  { %321 = vmatpush.msrb.mxu0 %v281_v47  ;;  %423 = vmatpush.msrb.mxu2 %v370_v1  ;;  %v358_v26 = vld [vmem:[%s2479_s8 + $0x50] sm:$0xff]  ;;  %v391_v29 = vld [vmem:[%s2479_s8 + $0x158] sm:$0xff]  ;;  %v388_v31 = vld [vmem:[%s2479_s8 + $0x140] sm:$0xff] }
  0x3c   :  { %341 = vmatpush.msrb.mxu1 %v282_v48  ;;  %441 = vmatpush.msrb.mxu3 %v406_v58  ;;  %v390_v27 = vld [vmem:[%s2479_s8 + $0x150] sm:$0xff]  ;;  %v357_v32 = vld [vmem:[%s2479_s8 + $0x48] sm:$0xff]  ;;  %v355_v36 = vld [vmem:[%s2479_s8 + $0x38] sm:$0xff] }
  0x3d   :  { %459 = vmatpush.msra.mxu0 %v379_v51  ;;  %424 = vmatpush.msrb.mxu2 %v368_v5  ;;  %v389_v33 = vld [vmem:[%s2479_s8 + $0x148] sm:$0xff]  ;;  %v354_v34 = vld [vmem:[%s2479_s8 + $0x30] sm:$0xff]  ;;  %v387_v37 = vld [vmem:[%s2479_s8 + $0x138] sm:$0xff] }
  0x3e   :  { %479 = vmatpush.msra.mxu1 %v411_v52  ;;  %442 = vmatpush.msrb.mxu3 %v404_v62  ;;  %v386_v35 = vld [vmem:[%s2479_s8 + $0x130] sm:$0xff]  ;;  %v384_v19 = vld [vmem:[%s2479_s8 + $0x120] sm:$0xff]  ;;  %v353_v43 = vld [vmem:[%s2479_s8 + $0x28] sm:$0xff] }
  0x3f   :  { %460 = vmatpush.msra.mxu0 %v377_v55  ;;  %425 = vmatpush.msrb.mxu2 %v366_v9  ;;  %v385_v44 = vld [vmem:[%s2479_s8 + $0x128] sm:$0xff]  ;;  %v350_v45 = vld [vmem:[%s2479_s8 + $0x10] sm:$0xff]  ;;  %v351_v47 = vld [vmem:[%s2479_s8 + $0x18] sm:$0xff] }
  0x40   :  { %480 = vmatpush.msra.mxu1 %v409_v56  ;;  %443 = vmatpush.msrb.mxu3 %v402_v2  ;;  %v382_v46 = vld [vmem:[%s2479_s8 + $0x110] sm:$0xff]  ;;  %v383_v48 = vld [vmem:[%s2479_s8 + $0x118] sm:$0xff]  ;;  %v348_v49 = vld [vmem:[%s2479_s8] sm:$0xff] }
  0x41   :  { %461 = vmatpush.msra.mxu0 %v375_v59  ;;  %426 = vmatpush.msrb.mxu2 %v364_v13  ;;  %v380_v50 = vld [vmem:[%s2479_s8 + $0x100] sm:$0xff]  ;;  %v349_v51 = vld [vmem:[%s2479_s8 + $0x8] sm:$0xff]  ;;  %v626_v54 = vld [vmem:[#allocation7 + $0x3e8] sm:$0xff] }
  0x42   :  { %481 = vmatpush.msra.mxu1 %v407_v60  ;;  %444 = vmatpush.msrb.mxu3 %v400_v6  ;;  %v381_v52 = vld [vmem:[%s2479_s8 + $0x108] sm:$0xff]  ;;  %v622_v56 = vld [vmem:[#allocation7 + $0x3c8] sm:$0xff] }
  0x43   :  { %462 = vmatpush.msra.mxu0 %v373_v63  ;;  %427 = vmatpush.msrb.mxu2 %v362_v17  ;;  %v625_v53 = vld [vmem:[#allocation7 + $0x3e0] sm:$0xff]  ;;  %v618_v58 = vld [vmem:[#allocation7 + $0x3a8] sm:$0xff] }
  0x44   :  { %482 = vmatpush.msra.mxu1 %v405_v0  ;;  %445 = vmatpush.msrb.mxu3 %v398_v10  ;;  %v621_v55 = vld [vmem:[#allocation7 + $0x3c0] sm:$0xff]  ;;  %v562_v60 = vld [vmem:[#allocation7 + $0x1e8] sm:$0xff] }
  0x45   :  { %463 = vmatpush.msra.mxu0 %v371_v3  ;;  %v617_v57 = vld [vmem:[#allocation7 + $0x3a0] sm:$0xff]  ;;  %v614_v63 = vld [vmem:[#allocation7 + $0x388] sm:$0xff] }
  0x46   :  { %483 = vmatpush.msra.mxu1 %v403_v4  ;;  %446 = vmatpush.msrb.mxu3 %v396_v14  ;;  %v561_v59 = vld [vmem:[#allocation7 + $0x1e0] sm:$0xff]  ;;  %v558_v0 = vld [vmem:[#allocation7 + $0x1c8] sm:$0xff] }
  0x47   :  { %464 = vmatpush.msra.mxu0 %v369_v7  ;;  %v557_v61 = vld [vmem:[#allocation7 + $0x1c0] sm:$0xff]  ;;  %v554_v2 = vld [vmem:[#allocation7 + $0x1a8] sm:$0xff] }
  0x48   :  { %484 = vmatpush.msra.mxu1 %v401_v8  ;;  %447 = vmatpush.msrb.mxu3 %v394_v18  ;;  %v613_v62 = vld [vmem:[#allocation7 + $0x380] sm:$0xff]  ;;  %v610_v4 = vld [vmem:[#allocation7 + $0x368] sm:$0xff] }
  0x49   :  { %465 = vmatpush.msra.mxu0 %v367_v11  ;;  %v553_v1 = vld [vmem:[#allocation7 + $0x1a0] sm:$0xff]  ;;  %v550_v6 = vld [vmem:[#allocation7 + $0x188] sm:$0xff] }
  0x4a   :  { %485 = vmatpush.msra.mxu1 %v399_v12  ;;  %v609_v3 = vld [vmem:[#allocation7 + $0x360] sm:$0xff]  ;;  %v606_v8 = vld [vmem:[#allocation7 + $0x348] sm:$0xff] }
  0x4b   :  { %466 = vmatpush.msra.mxu0 %v365_v15  ;;  %v549_v5 = vld [vmem:[#allocation7 + $0x180] sm:$0xff]  ;;  %v546_v10 = vld [vmem:[#allocation7 + $0x168] sm:$0xff] }
  0x4c   :  { %486 = vmatpush.msra.mxu1 %v397_v16  ;;  %v605_v7 = vld [vmem:[#allocation7 + $0x340] sm:$0xff]  ;;  %v602_v12 = vld [vmem:[#allocation7 + $0x328] sm:$0xff] }
  0x4d   :  { %v545_v9 = vld [vmem:[#allocation7 + $0x160] sm:$0xff]  ;;  %v542_v14 = vld [vmem:[#allocation7 + $0x148] sm:$0xff] }
  0x4e   :  { %v601_v11 = vld [vmem:[#allocation7 + $0x320] sm:$0xff]  ;;  %v598_v16 = vld [vmem:[#allocation7 + $0x308] sm:$0xff] }
  0x4f   :  { %v541_v13 = vld [vmem:[#allocation7 + $0x140] sm:$0xff]  ;;  %v538_v18 = vld [vmem:[#allocation7 + $0x128] sm:$0xff] }
  0x50   :  { %v597_v15 = vld [vmem:[#allocation7 + $0x300] sm:$0xff] }
  0x51   :  { %v537_v17 = vld [vmem:[#allocation7 + $0x120] sm:$0xff] }
  0xa7   :  { %v179_v20 = vpop.f32.mrf.mxu0 }
  0xaa   :  { %v207_v22 = vpop.f32.mrf.mxu1 }
  0xab   :  { %v208_v23 = vadd.f32 %v207_v22, %v179_v20  ;;  %v363_v20 = vld [vmem:[%s2479_s8 + $0x78] sm:$0xff]  ;;  %v360_v22 = vld [vmem:[%s2479_s8 + $0x60] sm:$0xff] }
  0xac   :  { %467 = vmatpush.msra.mxu0 %v363_v20  ;;  %428 = vmatpush.msrb.mxu2 %v360_v22  ;;  %v593_v20 = vld [vmem:[#allocation7 + $0x2e0] sm:$0xff] }
  0xad   :  { %v211_v24 = vadd.f32 %v210_v21, %v208_v23  ;;  %v395_v21 = vld [vmem:[%s2479_s8 + $0x178] sm:$0xff]  ;;  %v392_v23 = vld [vmem:[%s2479_s8 + $0x160] sm:$0xff]  ;;  %v533_v22 = vld [vmem:[#allocation7 + $0x100] sm:$0xff] }
  0xae   :  { %487 = vmatpush.msra.mxu1 %v395_v21  ;;  %448 = vmatpush.msrb.mxu3 %v392_v23  ;;  %v594_v21 = vld [vmem:[#allocation7 + $0x2e8] sm:$0xff] }
  0xaf   :  { %v212_v25 = vmax.f32 %v211_v24, 0.0  ;;  %v361_v24 = vld [vmem:[%s2479_s8 + $0x68] sm:$0xff]  ;;  %429 = vmatpush.msrb.mxu2 %v358_v26  ;;  %v534_v23 = vld [vmem:[#allocation7 + $0x108] sm:$0xff] }
  0xb0   :  { %468 = vmatpush.msra.mxu0 %v361_v24  ;;  %449 = vmatpush.msrb.mxu3 %v390_v27  ;;  %v589_v24 = vld [vmem:[#allocation7 + $0x2c0] sm:$0xff]  ;;  %v530_v27 = vld [vmem:[#allocation7 + $0xe8] sm:$0xff] }
  0xb1   :  { %1412 = vmatmul.msk.f32.vlgmr.msra.gmra.mxu2 %vm222_vm4, %v212_v25  ;;  %v393_v25 = vld [vmem:[%s2479_s8 + $0x168] sm:$0xff] }
  0xb2   :  { %488 = vmatpush.msra.mxu1 %v393_v25  ;;  %469 = vmatpush.msra.mxu0 %v359_v28  ;;  %v590_v25 = vld [vmem:[#allocation7 + $0x2c8] sm:$0xff]  ;;  %v529_v26 = vld [vmem:[#allocation7 + $0xe0] sm:$0xff] }
  0xb3   :  { %430 = vmatpush.msrb.mxu2 %v356_v30  ;;  %450 = vmatpush.msrb.mxu3 %v388_v31  ;;  %v585_v28 = vld [vmem:[#allocation7 + $0x2a0] sm:$0xff]  ;;  %v526_v31 = vld [vmem:[#allocation7 + $0xc8] sm:$0xff] }
  0xb4   :  { %489 = vmatpush.msra.mxu1 %v391_v29  ;;  %470 = vmatpush.msra.mxu0 %v357_v32  ;;  %v586_v29 = vld [vmem:[#allocation7 + $0x2a8] sm:$0xff]  ;;  %v525_v30 = vld [vmem:[#allocation7 + $0xc0] sm:$0xff]  ;;  %v297_v32 = vld [vmem:[#allocation6] ss:$2 sm:$0x3] }
  0xb5   :  { %431 = vmatpush.msrb.mxu2 %v354_v34  ;;  %451 = vmatpush.msrb.mxu3 %v386_v35  ;;  %v582_v34 = vld [vmem:[#allocation7 + $0x288] sm:$0xff]  ;;  %v521_v35 = vld [vmem:[#allocation7 + $0xa0] sm:$0xff] }
  0xb6   :  { %490 = vmatpush.msra.mxu1 %v389_v33  ;;  %471 = vmatpush.msra.mxu0 %v355_v36  ;;  %v581_v33 = vld [vmem:[#allocation7 + $0x280] sm:$0xff]  ;;  %v522_v36 = vld [vmem:[#allocation7 + $0xa8] sm:$0xff] }
  0xb7   :  { %452 = vmatpush.msrb.mxu3 %v384_v19  ;;  %v573_v19 = vld [vmem:[#allocation7 + $0x240] sm:$0xff] }
  0xb8   :  { %491 = vmatpush.msra.mxu1 %v387_v37  ;;  %472 = vmatpush.msra.mxu0 %v353_v43  ;;  %v577_v37 = vld [vmem:[#allocation7 + $0x260] sm:$0xff]  ;;  %v574_v43 = vld [vmem:[#allocation7 + $0x248] sm:$0xff] }
  0xb9   :  { %453 = vmatpush.msrb.mxu3 %v382_v46 }
  0xba   :  { %492 = vmatpush.msra.mxu1 %v385_v44  ;;  %473 = vmatpush.msra.mxu0 %v351_v47  ;;  %v513_v44 = vld [vmem:[#allocation7 + $0x60] sm:$0xff] }
  0xbb   :  { %454 = vmatpush.msrb.mxu3 %v380_v50 }
  0xbc   :  { %493 = vmatpush.msra.mxu1 %v383_v48  ;;  %474 = vmatpush.msra.mxu0 %v349_v51  ;;  %v569_v48 = vld [vmem:[#allocation7 + $0x220] sm:$0xff] }
  0xbe   :  { %494 = vmatpush.msra.mxu1 %v381_v52  ;;  %v509_v52 = vld [vmem:[#allocation7 + $0x40] sm:$0xff] }
 0x134   :  { %v243_v40 = vpop.f32.mrf.mxu2 }
 0x135   :  { %v244_v41 = vadd.f32 %v243_v40, %v221_v39 }
 0x137   :  { %v246_v42 = vmax.f32 %v244_v41, 0.0 }
 0x139   :  { %1413 = vmatmul.msk.f32.vlgmr.msra.gmra.mxu3 %vm222_vm4, %v246_v42  ;;  %v352_v42 = vld [vmem:[%s2479_s8 + $0x20] sm:$0xff] }
 0x13a   :  { %432 = vmatpush.msrb.mxu2 %v352_v42  ;;  %649 = vmatpush.msra.mxu3 %v625_v53  ;;  %v518_v42 = vld [vmem:[#allocation7 + $0x88] sm:$0xff] }
 0x13b   :  { %v510_v53 = vld [vmem:[#allocation7 + $0x48] sm:$0xff] }
 0x13c   :  { %433 = vmatpush.msrb.mxu2 %v350_v45  ;;  %650 = vmatpush.msra.mxu3 %v621_v55  ;;  %v514_v45 = vld [vmem:[#allocation7 + $0x68] sm:$0xff] }
 0x13e   :  { %434 = vmatpush.msrb.mxu2 %v348_v49  ;;  %651 = vmatpush.msra.mxu3 %v617_v57  ;;  %v570_v49 = vld [vmem:[#allocation7 + $0x228] sm:$0xff] }
 0x13f   :  { %v566_v57 = vld [vmem:[#allocation7 + $0x208] sm:$0xff] }
 0x140   :  { %629 = vmatpush.msra.mxu2 %v561_v59  ;;  %652 = vmatpush.msra.mxu3 %v613_v62  ;;  %v628_v59 = vld [vmem:[#allocation7 + $0x3f8] sm:$0xff]  ;;  %v623_v62 = vld [vmem:[#allocation7 + $0x3d0] sm:$0xff] }
 0x142   :  { %630 = vmatpush.msra.mxu2 %v557_v61  ;;  %653 = vmatpush.msra.mxu3 %v609_v3  ;;  %v506_v61 = vld [vmem:[#allocation7 + $0x28] sm:$0xff]  ;;  %v620_v3 = vld [vmem:[#allocation7 + $0x3b8] sm:$0xff] }
 0x144   :  { %631 = vmatpush.msra.mxu2 %v553_v1  ;;  %654 = vmatpush.msra.mxu3 %v605_v7  ;;  %v502_v1 = vld [vmem:[#allocation7 + $0x8] sm:$0xff]  ;;  %v616_v7 = vld [vmem:[#allocation7 + $0x398] sm:$0xff] }
 0x146   :  { %632 = vmatpush.msra.mxu2 %v549_v5  ;;  %655 = vmatpush.msra.mxu3 %v601_v11  ;;  %v564_v5 = vld [vmem:[#allocation7 + $0x1f8] sm:$0xff] }
 0x147   :  { %v612_v11 = vld [vmem:[#allocation7 + $0x378] sm:$0xff] }
 0x148   :  { %633 = vmatpush.msra.mxu2 %v545_v9  ;;  %656 = vmatpush.msra.mxu3 %v597_v15  ;;  %v560_v9 = vld [vmem:[#allocation7 + $0x1d8] sm:$0xff] }
 0x149   :  { %v608_v15 = vld [vmem:[#allocation7 + $0x358] sm:$0xff] }
 0x14a   :  { %634 = vmatpush.msra.mxu2 %v541_v13  ;;  %657 = vmatpush.msra.mxu3 %v593_v20  ;;  %v556_v13 = vld [vmem:[#allocation7 + $0x1b8] sm:$0xff] }
 0x14b   :  { %v604_v20 = vld [vmem:[#allocation7 + $0x338] sm:$0xff] }
 0x14c   :  { %635 = vmatpush.msra.mxu2 %v537_v17  ;;  %658 = vmatpush.msra.mxu3 %v589_v24  ;;  %v552_v17 = vld [vmem:[#allocation7 + $0x198] sm:$0xff] }
 0x14d   :  { %v600_v24 = vld [vmem:[#allocation7 + $0x318] sm:$0xff] }
 0x14e   :  { %636 = vmatpush.msra.mxu2 %v533_v22  ;;  %659 = vmatpush.msra.mxu3 %v585_v28  ;;  %v548_v22 = vld [vmem:[#allocation7 + $0x178] sm:$0xff] }
 0x14f   :  { %v596_v28 = vld [vmem:[#allocation7 + $0x2f8] sm:$0xff] }
 0x150   :  { %637 = vmatpush.msra.mxu2 %v529_v26  ;;  %660 = vmatpush.msra.mxu3 %v581_v33  ;;  %v595_v26 = vld [vmem:[#allocation7 + $0x2f0] sm:$0xff] }
 0x151   :  { %v535_v33 = vld [vmem:[#allocation7 + $0x110] sm:$0xff] }
 0x152   :  { %638 = vmatpush.msra.mxu2 %v525_v30  ;;  %661 = vmatpush.msra.mxu3 %v577_v37  ;;  %v591_v30 = vld [vmem:[#allocation7 + $0x2d0] sm:$0xff] }
 0x153   :  { %v531_v37 = vld [vmem:[#allocation7 + $0xf0] sm:$0xff] }
 0x154   :  { %639 = vmatpush.msra.mxu2 %v521_v35  ;;  %662 = vmatpush.msra.mxu3 %v573_v19  ;;  %v536_v35 = vld [vmem:[#allocation7 + $0x118] sm:$0xff] }
 0x155   :  { %v528_v19 = vld [vmem:[#allocation7 + $0xd8] sm:$0xff] }
 0x156   :  { %663 = vmatpush.msra.mxu3 %v569_v48  ;;  %v519_v48 = vld [vmem:[#allocation7 + $0x90] sm:$0xff] }
 0x1bc   :  { %v277_v39 = vpop.f32.mrf.mxu3 }
 0x1bd   :  { %v278_v40 = vadd.f32 %v277_v39, %v256_v38  ;;  %v578_v38 = vld [vmem:[#allocation7 + $0x268] sm:$0xff]  ;;  %v299_v39 = vperm.slane %v297_v32, 0 }
 0x1bf   :  { %v280_v41 = vmax.f32 %v278_v40, 0.0  ;;  %v300_v40 = vperm.slane %v297_v32, 1  ;;  %v592_v32 = vld [vmem:[#allocation7 + $0x2d8] sm:$0xff] }
 0x1c1   :  { %1414 = vmatmul.msk.f32.vlgmr.msrb.gmra.mxu0 %vm222_vm4, %v280_v41  ;;  %1415 = vmatmul.msk.f32.vlgmr.msrb.gmra.mxu1 %vm222_vm4, %v280_v41  ;;  %v517_v41 = vld [vmem:[#allocation7 + $0x80] sm:$0xff] }
 0x1c2   :  { %689 = vmatpush.msrb.mxu1 %v626_v54  ;;  %669 = vmatpush.msrb.mxu0 %v562_v60  ;;  %v505_v60 = vld [vmem:[#allocation7 + $0x20] sm:$0xff] }
 0x1c3   :  { %640 = vmatpush.msra.mxu2 %v517_v41  ;;  %v527_v41 = vld [vmem:[#allocation7 + $0xd0] sm:$0xff] }
 0x1c4   :  { %690 = vmatpush.msrb.mxu1 %v622_v56  ;;  %670 = vmatpush.msrb.mxu0 %v558_v0  ;;  %v565_v56 = vld [vmem:[#allocation7 + $0x200] sm:$0xff] }
 0x1c5   :  { %641 = vmatpush.msra.mxu2 %v513_v44  ;;  %664 = vmatpush.msra.mxu3 %v565_v56  ;;  %v501_v0 = vld [vmem:[#allocation7] sm:$0xff]  ;;  %v523_v44 = vld [vmem:[#allocation7 + $0xb0] sm:$0xff] }
 0x1c6   :  { %691 = vmatpush.msrb.mxu1 %v618_v58  ;;  %671 = vmatpush.msrb.mxu0 %v554_v2  ;;  %v627_v58 = vld [vmem:[#allocation7 + $0x3f0] sm:$0xff] }
 0x1c7   :  { %642 = vmatpush.msra.mxu2 %v509_v52  ;;  %v619_v2 = vld [vmem:[#allocation7 + $0x3b0] sm:$0xff] }
 0x1c8   :  { %692 = vmatpush.msrb.mxu1 %v614_v63  ;;  %672 = vmatpush.msrb.mxu0 %v550_v6  ;;  %v624_v63 = vld [vmem:[#allocation7 + $0x3d8] sm:$0xff]  ;;  %v615_v6 = vld [vmem:[#allocation7 + $0x390] sm:$0xff] }
 0x1c9   :  { %643 = vmatpush.msra.mxu2 %v505_v60  ;;  %v515_v52 = vld [vmem:[#allocation7 + $0x70] sm:$0xff] }
 0x1ca   :  { %693 = vmatpush.msrb.mxu1 %v610_v4  ;;  %673 = vmatpush.msrb.mxu0 %v546_v10  ;;  %v563_v4 = vld [vmem:[#allocation7 + $0x1f0] sm:$0xff] }
 0x1cb   :  { %644 = vmatpush.msra.mxu2 %v501_v0  ;;  %v611_v10 = vld [vmem:[#allocation7 + $0x370] sm:$0xff] }
 0x1cc   :  { %694 = vmatpush.msrb.mxu1 %v606_v8  ;;  %674 = vmatpush.msrb.mxu0 %v542_v14  ;;  %v559_v8 = vld [vmem:[#allocation7 + $0x1d0] sm:$0xff] }
 0x1cd   :  { %v607_v14 = vld [vmem:[#allocation7 + $0x350] sm:$0xff] }
 0x1ce   :  { %695 = vmatpush.msrb.mxu1 %v602_v12  ;;  %675 = vmatpush.msrb.mxu0 %v538_v18  ;;  %v555_v12 = vld [vmem:[#allocation7 + $0x1b0] sm:$0xff] }
 0x1cf   :  { %v603_v18 = vld [vmem:[#allocation7 + $0x330] sm:$0xff] }
 0x1d0   :  { %696 = vmatpush.msrb.mxu1 %v598_v16  ;;  %676 = vmatpush.msrb.mxu0 %v534_v23  ;;  %v551_v16 = vld [vmem:[#allocation7 + $0x190] sm:$0xff] }
 0x1d1   :  { %v599_v23 = vld [vmem:[#allocation7 + $0x310] sm:$0xff] }
 0x1d2   :  { %697 = vmatpush.msrb.mxu1 %v594_v21  ;;  %677 = vmatpush.msrb.mxu0 %v530_v27  ;;  %v547_v21 = vld [vmem:[#allocation7 + $0x170] sm:$0xff]  ;;  %v544_v27 = vld [vmem:[#allocation7 + $0x158] sm:$0xff] }
 0x1d3   :  { %v511_v56 = vld [vmem:[#allocation7 + $0x50] sm:$0xff] }
 0x1d4   :  { %698 = vmatpush.msrb.mxu1 %v590_v25  ;;  %678 = vmatpush.msrb.mxu0 %v526_v31  ;;  %v543_v25 = vld [vmem:[#allocation7 + $0x150] sm:$0xff]  ;;  %v540_v31 = vld [vmem:[#allocation7 + $0x138] sm:$0xff] }
 0x1d5   :  { %v503_v60 = vld [vmem:[#allocation7 + $0x10] sm:$0xff] }
 0x1d6   :  { %699 = vmatpush.msrb.mxu1 %v586_v29  ;;  %679 = vmatpush.msrb.mxu0 %v522_v36  ;;  %v539_v29 = vld [vmem:[#allocation7 + $0x130] sm:$0xff]  ;;  %v588_v36 = vld [vmem:[#allocation7 + $0x2b8] sm:$0xff] }
 0x1d8   :  { %700 = vmatpush.msrb.mxu1 %v582_v34  ;;  %680 = vmatpush.msrb.mxu0 %v518_v42  ;;  %v587_v34 = vld [vmem:[#allocation7 + $0x2b0] sm:$0xff] }
 0x1d9   :  { %v579_v42 = vld [vmem:[#allocation7 + $0x270] sm:$0xff] }
 0x1da   :  { %701 = vmatpush.msrb.mxu1 %v578_v38  ;;  %681 = vmatpush.msrb.mxu0 %v514_v45  ;;  %v583_v38 = vld [vmem:[#allocation7 + $0x290] sm:$0xff] }
 0x1db   :  { %v575_v45 = vld [vmem:[#allocation7 + $0x250] sm:$0xff] }
 0x1dc   :  { %702 = vmatpush.msrb.mxu1 %v574_v43  ;;  %682 = vmatpush.msrb.mxu0 %v510_v53  ;;  %v580_v43 = vld [vmem:[#allocation7 + $0x278] sm:$0xff]  ;;  %v567_v53 = vld [vmem:[#allocation7 + $0x210] sm:$0xff] }
 0x1de   :  { %703 = vmatpush.msrb.mxu1 %v570_v49  ;;  %683 = vmatpush.msrb.mxu0 %v506_v61  ;;  %v571_v49 = vld [vmem:[#allocation7 + $0x230] sm:$0xff]  ;;  %v504_v61 = vld [vmem:[#allocation7 + $0x18] sm:$0xff] }
 0x1e0   :  { %704 = vmatpush.msrb.mxu1 %v566_v57  ;;  %684 = vmatpush.msrb.mxu0 %v502_v1  ;;  %v512_v57 = vld [vmem:[#allocation7 + $0x58] sm:$0xff] }
 0x23e   :  { %v323_v46 = vpop.f32.mrf.mxu0  ;;  %v343_v47 = vpop.f32.mrf.mxu1 }
 0x23f   :  { %v324_v50 = vadd.f32 %v323_v46, %v299_v39  ;;  %v344_v51 = vadd.f32 %v343_v47, %v300_v40  ;;  %v532_v39 = vld [vmem:[#allocation7 + $0xf8] sm:$0xff] }
 0x240   :  { %v584_v40 = vld [vmem:[#allocation7 + $0x298] sm:$0xff] }
 0x241   :  { %v346_v54 = vmax.f32 %v324_v50, 0.0  ;;  %v347_v55 = vmax.f32 %v344_v51, 0.0  ;;  %v524_v46 = vld [vmem:[#allocation7 + $0xb8] sm:$0xff] }
 0x242   :  { %v576_v47 = vld [vmem:[#allocation7 + $0x258] sm:$0xff] }
 0x243   :  { %435 = vmatmul.f32.vlgmr.msrb.gmra.mxu2 %v346_v54  ;;  %455 = vmatmul.f32.vlgmr.msrb.gmra.mxu3 %v347_v55  ;;  %v520_v50 = vld [vmem:[#allocation7 + $0x98] sm:$0xff] }
 0x244   :  { %475 = vmatmul.f32.vlgmr.msra.gmra.mxu0 %v346_v54  ;;  %495 = vmatmul.f32.vlgmr.msra.gmra.mxu1 %v347_v55  ;;  %v572_v51 = vld [vmem:[#allocation7 + $0x238] sm:$0xff] }
 0x245   :  { %729 = vmatpush.msrb.mxu3 %v627_v58  ;;  %769 = vmatpush.msra.mxu1 %v628_v59  ;;  %v516_v54 = vld [vmem:[#allocation7 + $0x78] sm:$0xff]  ;;  %v507_v58 = vld [vmem:[#allocation7 + $0x30] sm:$0xff] }
 0x246   :  { %709 = vmatpush.msrb.mxu2 %v563_v4  ;;  %749 = vmatpush.msra.mxu0 %v564_v5  ;;  %v568_v55 = vld [vmem:[#allocation7 + $0x218] sm:$0xff] }
 0x247   :  { %730 = vmatpush.msrb.mxu3 %v623_v62  ;;  %770 = vmatpush.msra.mxu1 %v624_v63  ;;  %v508_v59 = vld [vmem:[#allocation7 + $0x38] sm:$0xff] }
 0x248   :  { %710 = vmatpush.msrb.mxu2 %v559_v8  ;;  %750 = vmatpush.msra.mxu0 %v560_v9  ;;  %v413_v62 = vld [vmem:[#allocation6 + $0x1] ss:$2 sm:$0x3] }
 0x249   :  { %731 = vmatpush.msrb.mxu3 %v619_v2  ;;  %771 = vmatpush.msra.mxu1 %v620_v3  ;;  %v416_v63 = vperm.slane %v413_v62, 1  ;;  %v415_v3 = vperm.slane %v413_v62, 0  ;;  %v870_v62 = vld [vmem:[#allocation10 + $0x78] sm:$0xff] }
 0x24a   :  { %711 = vmatpush.msrb.mxu2 %v555_v12  ;;  %751 = vmatpush.msra.mxu0 %v556_v13  ;;  %v2022_v13 = vld [vmem:[%s2484_s13 + $0xe8] sm:$0xff] }
 0x24b   :  { %732 = vmatpush.msrb.mxu3 %v615_v6  ;;  %772 = vmatpush.msra.mxu1 %v616_v7  ;;  %v2010_v7 = vld [vmem:[%s2484_s13 + $0xf8] sm:$0xff] }
 0x24c   :  { %712 = vmatpush.msrb.mxu2 %v551_v16  ;;  %752 = vmatpush.msra.mxu0 %v552_v17  ;;  %v2039_v16 = vld [vmem:[%s2484_s13 + $0x70] sm:$0xff]  ;;  %v2044_v17 = vld [vmem:[%s2484_s13 + $0xd8] sm:$0xff] }
 0x24d   :  { %733 = vmatpush.msrb.mxu3 %v611_v10  ;;  %773 = vmatpush.msra.mxu1 %v612_v11  ;;  %v2015_v10 = vld [vmem:[%s2484_s13 + $0xf0] sm:$0xff] }
 0x24e   :  { %713 = vmatpush.msrb.mxu2 %v547_v21  ;;  %753 = vmatpush.msra.mxu0 %v548_v22  ;;  %v2064_v21 = vld [vmem:[%s2484_s13 + $0x60] sm:$0xff]  ;;  %v2069_v22 = vld [vmem:[%s2484_s13 + $0xc8] sm:$0xff] }
 0x24f   :  { %734 = vmatpush.msrb.mxu3 %v607_v14  ;;  %774 = vmatpush.msra.mxu1 %v608_v15  ;;  %v2027_v14 = vld [vmem:[%s2484_s13 + $0x78] sm:$0xff]  ;;  %v2034_v15 = vld [vmem:[%s2484_s13 + $0xe0] sm:$0xff] }
 0x250   :  { %714 = vmatpush.msrb.mxu2 %v543_v25  ;;  %754 = vmatpush.msra.mxu0 %v544_v27  ;;  %v2086_v25 = vld [vmem:[%s2484_s13 + $0x50] sm:$0xff]  ;;  %v2100_v27 = vld [vmem:[%s2484_s13 + $0x48] sm:$0xff] }
 0x251   :  { %735 = vmatpush.msrb.mxu3 %v603_v18  ;;  %775 = vmatpush.msra.mxu1 %v604_v20  ;;  %v2049_v18 = vld [vmem:[%s2484_s13 + $0x68] sm:$0xff]  ;;  %v2058_v20 = vld [vmem:[%s2484_s13 + $0xd0] sm:$0xff] }
 0x252   :  { %715 = vmatpush.msrb.mxu2 %v539_v29  ;;  %755 = vmatpush.msra.mxu0 %v540_v31  ;;  %v2112_v29 = vld [vmem:[%s2484_s13 + $0x40] sm:$0xff]  ;;  %v2124_v31 = vld [vmem:[%s2484_s13 + $0x38] sm:$0xff] }
 0x253   :  { %736 = vmatpush.msrb.mxu3 %v599_v23  ;;  %776 = vmatpush.msra.mxu1 %v600_v24  ;;  %v2076_v23 = vld [vmem:[%s2484_s13 + $0x58] sm:$0xff]  ;;  %v2081_v24 = vld [vmem:[%s2484_s13 + $0xc0] sm:$0xff] }
 0x254   :  { %716 = vmatpush.msrb.mxu2 %v535_v33  ;;  %756 = vmatpush.msra.mxu0 %v536_v35  ;;  %v2136_v33 = vld [vmem:[%s2484_s13 + $0x30] sm:$0xff]  ;;  %v2148_v35 = vld [vmem:[%s2484_s13 + $0x28] sm:$0xff] }
 0x255   :  { %737 = vmatpush.msrb.mxu3 %v595_v26  ;;  %777 = vmatpush.msra.mxu1 %v596_v28  ;;  %v2091_v26 = vld [vmem:[%s2484_s13 + $0xb8] sm:$0xff]  ;;  %v2105_v28 = vld [vmem:[%s2484_s13 + $0xb0] sm:$0xff] }
 0x256   :  { %717 = vmatpush.msrb.mxu2 %v531_v37  ;;  %757 = vmatpush.msra.mxu0 %v532_v39  ;;  %v2160_v37 = vld [vmem:[%s2484_s13 + $0x20] sm:$0xff]  ;;  %v2172_v39 = vld [vmem:[%s2484_s13 + $0x18] sm:$0xff] }
 0x257   :  { %738 = vmatpush.msrb.mxu3 %v591_v30  ;;  %778 = vmatpush.msra.mxu1 %v592_v32  ;;  %v2117_v30 = vld [vmem:[%s2484_s13 + $0xa8] sm:$0xff]  ;;  %v2129_v32 = vld [vmem:[%s2484_s13 + $0xa0] sm:$0xff] }
 0x258   :  { %718 = vmatpush.msrb.mxu2 %v527_v41  ;;  %758 = vmatpush.msra.mxu0 %v528_v19  ;;  %v2184_v41 = vld [vmem:[%s2484_s13 + $0x10] sm:$0xff]  ;;  %v2196_v19 = vld [vmem:[%s2484_s13] sm:$0xff] }
 0x259   :  { %739 = vmatpush.msrb.mxu3 %v587_v34  ;;  %779 = vmatpush.msra.mxu1 %v588_v36  ;;  %v2141_v34 = vld [vmem:[%s2484_s13 + $0x98] sm:$0xff]  ;;  %v2153_v36 = vld [vmem:[%s2484_s13 + $0x90] sm:$0xff] }
 0x25a   :  { %719 = vmatpush.msrb.mxu2 %v523_v44  ;;  %759 = vmatpush.msra.mxu0 %v524_v46  ;;  %v1037_v44 = vld [vmem:[%s2481_s10 + $0x8] sm:$0xff] }
 0x25b   :  { %740 = vmatpush.msrb.mxu3 %v583_v38  ;;  %780 = vmatpush.msra.mxu1 %v584_v40  ;;  %v2165_v38 = vld [vmem:[%s2484_s13 + $0x88] sm:$0xff]  ;;  %v2177_v40 = vld [vmem:[%s2484_s13 + $0x80] sm:$0xff] }
 0x25c   :  { %720 = vmatpush.msrb.mxu2 %v519_v48  ;;  %760 = vmatpush.msra.mxu0 %v520_v50 }
 0x25d   :  { %741 = vmatpush.msrb.mxu3 %v579_v42  ;;  %781 = vmatpush.msra.mxu1 %v580_v43  ;;  %v2190_v42 = vld [vmem:[%s2484_s13 + $0x8] sm:$0xff]  ;;  %v1038_v43 = vld [vmem:[%s2481_s10 + $0x10] sm:$0x3f] }
 0x25e   :  { %721 = vmatpush.msrb.mxu2 %v515_v52  ;;  %761 = vmatpush.msra.mxu0 %v516_v54 }
 0x25f   :  { %742 = vmatpush.msrb.mxu3 %v575_v45  ;;  %782 = vmatpush.msra.mxu1 %v576_v47  ;;  %v1036_v45 = vld [vmem:[%s2481_s10] sm:$0xff] }
 0x260   :  { %722 = vmatpush.msrb.mxu2 %v511_v56  ;;  %762 = vmatpush.msra.mxu0 %v512_v57 }
 0x261   :  { %743 = vmatpush.msrb.mxu3 %v571_v49  ;;  %783 = vmatpush.msra.mxu1 %v572_v51 }
 0x262   :  { %723 = vmatpush.msrb.mxu2 %v507_v58  ;;  %763 = vmatpush.msra.mxu0 %v508_v59 }
 0x263   :  { %744 = vmatpush.msrb.mxu3 %v567_v53  ;;  %784 = vmatpush.msra.mxu1 %v568_v55 }
 0x264   :  { %724 = vmatpush.msrb.mxu2 %v503_v60  ;;  %764 = vmatpush.msra.mxu0 %v504_v61  ;;  %v1453_v60 = vld [vmem:[%s2500_s27] sm:$0xff] }
 0x265   :  { %v869_v61 = vld [vmem:[#allocation10 + $0x70] sm:$0xff] }
 0x2c1   :  { %v476_v0 = vpop.f32.mrf.mxu0  ;;  %v496_v2 = vpop.f32.mrf.mxu1 }
 0x2c2   :  { %v477_v1 = vadd.f32 %v476_v0, %v416_v63  ;;  %v867_v63 = vld [vmem:[#allocation10 + $0x60] sm:$0xff]  ;;  %v868_v0 = vld [vmem:[#allocation10 + $0x68] sm:$0xff] }
 0x2c4   :  { %v497_v4 = vadd.f32 %v496_v2, %v477_v1  ;;  %v865_v1 = vld [vmem:[#allocation10 + $0x50] sm:$0xff]  ;;  %v866_v2 = vld [vmem:[#allocation10 + $0x58] sm:$0xff] }
 0x2c6   :  { %v500_v5 = vmax.f32 %v497_v4, 0.0  ;;  %v436_v6 = vpop.f32.mrf.mxu2  ;;  %v456_v9 = vpop.f32.mrf.mxu3  ;;  %v864_v4 = vld [vmem:[#allocation10 + $0x48] sm:$0xff] }
 0x2c7   :  { %v437_v8 = vadd.f32 %v436_v6, %v415_v3  ;;  %v863_v3 = vld [vmem:[#allocation10 + $0x40] sm:$0xff]  ;;  %v862_v6 = vld [vmem:[#allocation10 + $0x38] sm:$0xff] }
 0x2c8   :  { %665 = vmatmul.f32.vlgmr.msra.gmra.mxu3 %v500_v5  ;;  %705 = vmatmul.f32.vlgmr.msrb.gmra.mxu1 %v500_v5 }
 0x2c9   :  { %v457_v11 = vadd.f32 %v456_v9, %v437_v8  ;;  %893 = vmatpush.msra.mxu3 %v2010_v7  ;;  %v859_v8 = vld [vmem:[#allocation10 + $0x20] sm:$0xff]  ;;  %v860_v9 = vld [vmem:[#allocation10 + $0x28] sm:$0xff] }
 0x2cb   :  { %v499_v12 = vmax.f32 %v457_v11, 0.0  ;;  %894 = vmatpush.msra.mxu3 %v2015_v10  ;;  %v857_v11 = vld [vmem:[#allocation10 + $0x10] sm:$0xff] }
 0x2cd   :  { %645 = vmatmul.f32.vlgmr.msra.gmra.mxu2 %v499_v12  ;;  %685 = vmatmul.f32.vlgmr.msrb.gmra.mxu0 %v499_v12 }
 0x2ce   :  { %895 = vmatpush.msra.mxu3 %v2022_v13  ;;  %873 = vmatpush.msra.mxu2 %v2027_v14 }
 0x2d0   :  { %745 = vmatmul.f32.vlgmr.msrb.gmra.mxu3 %v500_v5  ;;  %785 = vmatmul.f32.vlgmr.msra.gmra.mxu1 %v500_v5  ;;  %v861_v5 = vld [vmem:[#allocation10 + $0x30] sm:$0xff] }
 0x2d1   :  { %896 = vmatpush.msra.mxu3 %v2034_v15  ;;  %874 = vmatpush.msra.mxu2 %v2039_v16 }
 0x2d3   :  { %897 = vmatpush.msra.mxu3 %v2044_v17  ;;  %875 = vmatpush.msra.mxu2 %v2049_v18 }
 0x2d5   :  { %725 = vmatmul.f32.vlgmr.msrb.gmra.mxu2 %v499_v12  ;;  %765 = vmatmul.f32.vlgmr.msra.gmra.mxu0 %v499_v12  ;;  %v858_v12 = vld [vmem:[#allocation10 + $0x18] sm:$0xff] }
 0x2d6   :  { %898 = vmatpush.msra.mxu3 %v2058_v20  ;;  %876 = vmatpush.msra.mxu2 %v2064_v21 }
 0x2d8   :  { %899 = vmatpush.msra.mxu3 %v2069_v22  ;;  %877 = vmatpush.msra.mxu2 %v2076_v23 }
 0x2da   :  { %900 = vmatpush.msra.mxu3 %v2081_v24  ;;  %878 = vmatpush.msra.mxu2 %v2086_v25 }
 0x2dc   :  { %901 = vmatpush.msra.mxu3 %v2091_v26  ;;  %879 = vmatpush.msra.mxu2 %v2100_v27 }
 0x2de   :  { %902 = vmatpush.msra.mxu3 %v2105_v28  ;;  %880 = vmatpush.msra.mxu2 %v2112_v29 }
 0x2e0   :  { %903 = vmatpush.msra.mxu3 %v2117_v30  ;;  %881 = vmatpush.msra.mxu2 %v2124_v31 }
 0x2e2   :  { %904 = vmatpush.msra.mxu3 %v2129_v32  ;;  %882 = vmatpush.msra.mxu2 %v2136_v33 }
 0x2e4   :  { %905 = vmatpush.msra.mxu3 %v2141_v34  ;;  %883 = vmatpush.msra.mxu2 %v2148_v35 }
 0x2e6   :  { %906 = vmatpush.msra.mxu3 %v2153_v36  ;;  %884 = vmatpush.msra.mxu2 %v2160_v37 }
 0x2e8   :  { %907 = vmatpush.msra.mxu3 %v2165_v38  ;;  %885 = vmatpush.msra.mxu2 %v2172_v39 }
 0x2ea   :  { %908 = vmatpush.msra.mxu3 %v2177_v40  ;;  %886 = vmatpush.msra.mxu2 %v2184_v41 }
 0x2ec   :  { %887 = vmatpush.msra.mxu2 %v2190_v42  ;;  %1073 = vmatpush.msrb.mxu3 %v869_v61  ;;  %v833_v61 = vld [vmem:[%s2486_s15 + $0x50] sm:$0xff] }
 0x2ee   :  { %888 = vmatpush.msra.mxu2 %v2196_v19  ;;  %1074 = vmatpush.msrb.mxu3 %v867_v63 }
 0x2f0   :  { %1418 = vmatpush.msk.msrb.mxu2 %vm186_vm0, %v1038_v43  ;;  %1075 = vmatpush.msrb.mxu3 %v865_v1  ;;  %v855_v43 = vld [vmem:[#allocation10] sm:$0xff] }
 0x2f2   :  { %1056 = vmatpush.msrb.mxu2 %v1037_v44  ;;  %1076 = vmatpush.msrb.mxu3 %v863_v3  ;;  %v856_v44 = vld [vmem:[#allocation10 + $0x8] sm:$0xff]  ;;  %v2287_v3 = vld [vmem:[%s2486_s15 + $0xc8] sm:$0xff] }
 0x2f4   :  { %1057 = vmatpush.msrb.mxu2 %v1036_v45  ;;  %1077 = vmatpush.msrb.mxu3 %v861_v5  ;;  %v2228_v45 = vld [vmem:[%s2485_s14] sm:$0xff] }
 0x2f5   :  { %943 = vmatpush.msrb.mxu0 %v2228_v45  ;;  %v831_v5 = vld [vmem:[%s2486_s15 + $0x40] sm:$0xff] }
 0x2f6   :  { %1078 = vmatpush.msrb.mxu3 %v859_v8  ;;  %v830_v8 = vld [vmem:[%s2486_s15 + $0x38] sm:$0xff] }
 0x2f8   :  { %1079 = vmatpush.msrb.mxu3 %v857_v11  ;;  %v829_v11 = vld [vmem:[%s2486_s15 + $0x30] sm:$0xff] }
 0x2fa   :  { %1080 = vmatpush.msrb.mxu3 %v855_v43 }
 0x345   :  { %v706_v46 = vpop.f32.mrf.mxu1 }
 0x34a   :  { %v686_v47 = vpop.f32.mrf.mxu0 }
 0x34b   :  { %v2209_v48 = vadd.f32 %v706_v46, %v686_v47  ;;  %v666_v49 = vpop.f32.mrf.mxu3  ;;  %v822_v46 = vld [vmem:[%s2485_s14 + $0x8] sm:$0xff]  ;;  %v838_v47 = vld [vmem:[%s2486_s15 + $0x78] sm:$0xff] }
 0x34c   :  { %963 = vmatpush.msrb.mxu1 %v822_v46  ;;  %970 = vmatpush.msra.mxu0 %v838_v47 }
 0x34d   :  { %v786_v52 = vpop.f32.mrf.mxu1 }
 0x350   :  { %v646_v50 = vpop.f32.mrf.mxu2 }
 0x351   :  { %v2211_v51 = vadd.f32 %v666_v49, %v646_v50  ;;  %v854_v49 = vld [vmem:[%s2486_s15 + $0xf8] sm:$0xff]  ;;  %v837_v50 = vld [vmem:[%s2486_s15 + $0x70] sm:$0xff] }
 0x352   :  { %v766_v53 = vpop.f32.mrf.mxu0  ;;  %990 = vmatpush.msra.mxu1 %v854_v49  ;;  %971 = vmatpush.msra.mxu0 %v837_v50 }
 0x353   :  { %v2213_v54 = vadd.f32 %v786_v52, %v766_v53  ;;  %v746_v56 = vpop.f32.mrf.mxu3  ;;  %v853_v52 = vld [vmem:[%s2486_s15 + $0xf0] sm:$0xff]  ;;  %v836_v53 = vld [vmem:[%s2486_s15 + $0x68] sm:$0xff] }
 0x354   :  { %991 = vmatpush.msra.mxu1 %v853_v52  ;;  %972 = vmatpush.msra.mxu0 %v836_v53 }
 0x355   :  { %v872_v55 = vmul.f32 %v2213_v54, %v2213_v54 }
 0x357   :  { %909 = vmatmul.f32.vlgmr.msra.gmra.mxu3 %v872_v55  ;;  %v2252_v55 = vld [vmem:[%s2486_s15 + $0xe8] sm:$0xff] }
 0x358   :  { %v726_v57 = vpop.f32.mrf.mxu2  ;;  %1231 = vmatpush.msra.mxu3 %v838_v47  ;;  %992 = vmatpush.msra.mxu1 %v2252_v55 }
 0x359   :  { %v2217_v58 = vadd.f32 %v746_v56, %v726_v57  ;;  %v835_v56 = vld [vmem:[%s2486_s15 + $0x60] sm:$0xff] }
 0x35a   :  { %v2260_v57 = vld [vmem:[%s2486_s15 + $0xe0] sm:$0xff]  ;;  %1232 = vmatpush.msra.mxu3 %v837_v50  ;;  %973 = vmatpush.msra.mxu0 %v835_v56 }
 0x35b   :  { %v871_v59 = vmul.f32 %v2217_v58, %v2217_v58  ;;  %993 = vmatpush.msra.mxu1 %v2260_v57  ;;  %v827_v50 = vld [vmem:[%s2486_s15 + $0x20] sm:$0xff] }
 0x35c   :  { %1233 = vmatpush.msra.mxu3 %v836_v53  ;;  %v2337_v53 = vld [vmem:[%s2486_s15 + $0xa0] sm:$0xff] }
 0x35d   :  { %889 = vmatmul.f32.vlgmr.msra.gmra.mxu2 %v871_v59  ;;  %v834_v59 = vld [vmem:[%s2486_s15 + $0x58] sm:$0xff] }
 0x35e   :  { %1093 = vmatpush.msra.mxu2 %v870_v62  ;;  %v2278_v62 = vld [vmem:[%s2486_s15 + $0xd0] sm:$0xff]  ;;  %1234 = vmatpush.msra.mxu3 %v835_v56 }
 0x35f   :  { %974 = vmatpush.msra.mxu0 %v834_v59 }
 0x360   :  { %1094 = vmatpush.msra.mxu2 %v868_v0  ;;  %1235 = vmatpush.msra.mxu3 %v834_v59  ;;  %v826_v59 = vld [vmem:[%s2486_s15 + $0x18] sm:$0xff] }
 0x361   :  { %975 = vmatpush.msra.mxu0 %v833_v61 }
 0x362   :  { %1095 = vmatpush.msra.mxu2 %v866_v2  ;;  %v832_v2 = vld [vmem:[%s2486_s15 + $0x48] sm:$0xff]  ;;  %1236 = vmatpush.msra.mxu3 %v833_v61  ;;  %v842_v61 = vld [vmem:[%s2486_s15 + $0x98] sm:$0xff] }
 0x363   :  { %976 = vmatpush.msra.mxu0 %v832_v2 }
 0x364   :  { %1096 = vmatpush.msra.mxu2 %v864_v4  ;;  %1237 = vmatpush.msra.mxu3 %v832_v2  ;;  %v840_v2 = vld [vmem:[%s2486_s15 + $0x88] sm:$0xff] }
 0x365   :  { %1419 = vmatmul.msk.f32.vlgmr.msrb.gmra.mxu2 %vm182_vm3, %v1453_v60  ;;  %v2269_v60 = vld [vmem:[%s2486_s15 + $0xd8] sm:$0xff]  ;;  %977 = vmatpush.msra.mxu0 %v831_v5 }
 0x366   :  { %1097 = vmatpush.msra.mxu2 %v862_v6  ;;  %994 = vmatpush.msra.mxu1 %v2269_v60  ;;  %v2298_v6 = vld [vmem:[%s2486_s15 + $0xc0] sm:$0xff] }
 0x367   :  { %1238 = vmatpush.msra.mxu3 %v831_v5  ;;  %978 = vmatpush.msra.mxu0 %v830_v8 }
 0x368   :  { %1098 = vmatpush.msra.mxu2 %v860_v9  ;;  %995 = vmatpush.msra.mxu1 %v2278_v62  ;;  %v2308_v9 = vld [vmem:[%s2486_s15 + $0xb8] sm:$0xff] }
 0x369   :  { %979 = vmatpush.msra.mxu0 %v829_v11  ;;  %1239 = vmatpush.msra.mxu3 %v830_v8  ;;  %v839_v8 = vld [vmem:[%s2486_s15 + $0x80] sm:$0xff] }
 0x36a   :  { %1099 = vmatpush.msra.mxu2 %v858_v12  ;;  %996 = vmatpush.msra.mxu1 %v2287_v3  ;;  %v2317_v12 = vld [vmem:[%s2486_s15 + $0xb0] sm:$0xff] }
 0x36b   :  { %1240 = vmatpush.msra.mxu3 %v829_v11 }
 0x36c   :  { %1100 = vmatpush.msra.mxu2 %v856_v44  ;;  %997 = vmatpush.msra.mxu1 %v2298_v6  ;;  %v828_v44 = vld [vmem:[%s2486_s15 + $0x28] sm:$0xff] }
 0x36d   :  { %980 = vmatpush.msra.mxu0 %v828_v44  ;;  %1241 = vmatpush.msra.mxu3 %v828_v44 }
 0x36e   :  { %1224 = vmatpush.msrb.mxu2 %v822_v46  ;;  %998 = vmatpush.msra.mxu1 %v2308_v9  ;;  %v2328_v46 = vld [vmem:[%s2486_s15 + $0xa8] sm:$0xff] }
 0x36f   :  { %981 = vmatpush.msra.mxu0 %v827_v50  ;;  %1242 = vmatpush.msra.mxu3 %v827_v50 }
 0x370   :  { %999 = vmatpush.msra.mxu1 %v2317_v12 }
 0x371   :  { %982 = vmatpush.msra.mxu0 %v826_v59  ;;  %1243 = vmatpush.msra.mxu3 %v826_v59 }
 0x372   :  { %1000 = vmatpush.msra.mxu1 %v2328_v46 }
 0x374   :  { %1001 = vmatpush.msra.mxu1 %v2337_v53 }
 0x376   :  { %1002 = vmatpush.msra.mxu1 %v842_v61 }
 0x3da   :  { %v910_v63 = vpop.f32.mrf.mxu3 }
 0x3e0   :  { %v890_v0 = vpop.f32.mrf.mxu2 }
 0x3e1   :  { %v911_v1 = vadd.f32 %v910_v63, %v890_v0  ;;  %v841_v0 = vld [vmem:[%s2486_s15 + $0x90] sm:$0xff] }
 0x3e2   :  { %1003 = vmatpush.msra.mxu1 %v841_v0 }
 0x3e3   :  { %v2290_v4 = vmax.f32 %v911_v1, 1e-24 }
 0x3e4   :  { %1004 = vmatpush.msra.mxu1 %v840_v2 }
 0x3e5   :  { %1445 = vrsqrt.f32 %v2290_v4  ;;  %vm920_vm6 = vweird.f32 %v2290_v4 }
 0x3e6   :  { %1005 = vmatpush.msra.mxu1 %v839_v8 }
 0x3e8   :  { %v1059_v43 = vpop.f32.mrf.mxu2 }
 0x3e9   :  { %1420 = vmatmul.msk.f32.vlgmr.msrb.gmra.mxu3 %vm222_vm4, %v1059_v43  ;;  %1421 = vmatmul.msk.f32.vlgmr.msra.gmra.mxu2 %vm222_vm4, %v1059_v43 }
 0x3ea   :  { %1251 = vmatpush.msra.mxu2 %v854_v49  ;;  %v825_v49 = vld [vmem:[%s2486_s15 + $0x10] sm:$0xff] }
 0x3eb   :  { %v1446_v47 = vpop.eup %1445  ;;  %983 = vmatpush.msra.mxu0 %v825_v49  ;;  %1244 = vmatpush.msra.mxu3 %v825_v49 }
 0x3ec   :  { %v915_v56 = vmul.f32 %v1446_v47, %v2290_v4  ;;  %1252 = vmatpush.msra.mxu2 %v853_v52  ;;  %v824_v52 = vld [vmem:[%s2486_s15 + $0x8] sm:$0xff]  ;;  %vm921_vm5 = vweird.f32 %v1446_v47 }
 0x3ed   :  { %984 = vmatpush.msra.mxu0 %v824_v52  ;;  %vm922_vm8 = vmor %vm920_vm6, %vm921_vm5  ;;  %1245 = vmatpush.msra.mxu3 %v824_v52 }
 0x3ee   :  { %v916_v63 = vmul.f32 %v1446_v47, %v915_v56  ;;  %1253 = vmatpush.msra.mxu2 %v2252_v55  ;;  %v823_v55 = vld [vmem:[%s2486_s15] sm:$0xff] }
 0x3ef   :  { %985 = vmatpush.msra.mxu0 %v823_v55  ;;  %1246 = vmatpush.msra.mxu3 %v823_v55 }
 0x3f0   :  { %v917_v1 = vmul.f32 0.5, %v916_v63  ;;  %1254 = vmatpush.msra.mxu2 %v2260_v57 }
 0x3f2   :  { %v918_v5 = vsub.f32 1.5, %v917_v1  ;;  %1255 = vmatpush.msra.mxu2 %v2269_v60 }
 0x3f4   :  { %v919_v11 = vmul.f32 %v1446_v47, %v918_v5  ;;  %1256 = vmatpush.msra.mxu2 %v2278_v62 }
 0x3f6   :  { %v923_v57 = vsel %vm922_vm8, %v1446_v47, %v919_v11  ;;  %1257 = vmatpush.msra.mxu2 %v2287_v3 }
 0x3f7   :  { %1416 = vmatmul.msk.f32.vlgmr.msrb.gmra.mxu0 %vm924_vm7, %v923_v57  ;;  %1417 = vmatmul.msk.f32.vlgmr.msrb.gmra.mxu1 %vm924_vm7, %v923_v57 }
 0x3f8   :  { %1107 = vmatpush.msrb.mxu0 %v2027_v14  ;;  %1127 = vmatpush.msrb.mxu1 %v2010_v7 }
 0x3f9   :  { %1258 = vmatpush.msra.mxu2 %v2298_v6 }
 0x3fa   :  { %1108 = vmatpush.msrb.mxu0 %v2039_v16  ;;  %1128 = vmatpush.msrb.mxu1 %v2015_v10 }
 0x3fb   :  { %1259 = vmatpush.msra.mxu2 %v2308_v9 }
 0x3fc   :  { %1109 = vmatpush.msrb.mxu0 %v2049_v18  ;;  %1129 = vmatpush.msrb.mxu1 %v2022_v13 }
 0x3fd   :  { %1260 = vmatpush.msra.mxu2 %v2317_v12 }
 0x3fe   :  { %1110 = vmatpush.msrb.mxu0 %v2064_v21  ;;  %1130 = vmatpush.msrb.mxu1 %v2034_v15 }
 0x3ff   :  { %1261 = vmatpush.msra.mxu2 %v2328_v46 }
 0x400   :  { %1111 = vmatpush.msrb.mxu0 %v2076_v23  ;;  %1131 = vmatpush.msrb.mxu1 %v2044_v17 }
 0x401   :  { %1262 = vmatpush.msra.mxu2 %v2337_v53 }
 0x402   :  { %1112 = vmatpush.msrb.mxu0 %v2086_v25  ;;  %1132 = vmatpush.msrb.mxu1 %v2058_v20  ;;  %v1147_v25 = vlaneseq }
 0x403   :  { %1263 = vmatpush.msra.mxu2 %v842_v61 }
 0x404   :  { %1113 = vmatpush.msrb.mxu0 %v2100_v27  ;;  %1133 = vmatpush.msrb.mxu1 %v2069_v22 }
 0x405   :  { %1264 = vmatpush.msra.mxu2 %v841_v0 }
 0x406   :  { %1114 = vmatpush.msrb.mxu0 %v2112_v29  ;;  %1134 = vmatpush.msrb.mxu1 %v2081_v24 }
 0x407   :  { %1265 = vmatpush.msra.mxu2 %v840_v2 }
 0x408   :  { %1115 = vmatpush.msrb.mxu0 %v2124_v31  ;;  %1135 = vmatpush.msrb.mxu1 %v2091_v26 }
 0x409   :  { %1266 = vmatpush.msra.mxu2 %v839_v8 }
 0x40a   :  { %1116 = vmatpush.msrb.mxu0 %v2136_v33  ;;  %1136 = vmatpush.msrb.mxu1 %v2105_v28  ;;  %v1148_v28 = vand.u32 127, %v1147_v25 }
 0x40c   :  { %1117 = vmatpush.msrb.mxu0 %v2148_v35  ;;  %1137 = vmatpush.msrb.mxu1 %v2117_v30  ;;  %vm1149_vm9 = vcmp.lt.s32.totalorder %v1148_v28, 4  ;;  %v1286_v28 = vld [vmem:[#allocation2 + $0xa0] sm:$0xff] }
 0x40e   :  { %1118 = vmatpush.msrb.mxu0 %v2160_v37  ;;  %1138 = vmatpush.msrb.mxu1 %v2129_v32 }
 0x410   :  { %1119 = vmatpush.msrb.mxu0 %v2172_v39  ;;  %1139 = vmatpush.msrb.mxu1 %v2141_v34 }
 0x412   :  { %1120 = vmatpush.msrb.mxu0 %v2184_v41  ;;  %1140 = vmatpush.msrb.mxu1 %v2153_v36 }
 0x414   :  { %1121 = vmatpush.msrb.mxu0 %v2190_v42  ;;  %1141 = vmatpush.msrb.mxu1 %v2165_v38 }
 0x416   :  { %1122 = vmatpush.msrb.mxu0 %v2196_v19  ;;  %1142 = vmatpush.msrb.mxu1 %v2177_v40 }
 0x46c   :  { %v1082_v18 = vpop.f32.mrf.mxu3  ;;  %v1102_v20 = vpop.f32.mrf.mxu2 }
 0x46d   :  { %v1105_v21 = vmul.f32 %v1082_v18, %v2211_v51  ;;  %v1106_v22 = vmul.f32 %v1102_v20, %v2209_v48  ;;  %v1287_v18 = vld [vmem:[#allocation2 + $0xa8] sm:$0xff] }
 0x474   :  { %v945_v7 = vpop.f32.mrf.mxu0  ;;  %v965_v10 = vpop.f32.mrf.mxu1 }
 0x475   :  { %v968_v13 = vmul.f32 %v945_v7, %v2217_v58  ;;  %v969_v14 = vmul.f32 %v965_v10, %v2213_v54 }
 0x477   :  { %v1021_v15 = vmul.f32 %v968_v13, %v968_v13  ;;  %v1022_v16 = vmul.f32 %v969_v14, %v969_v14  ;;  %986 = vmatmul.f32.vlgmr.msra.gmra.mxu0 %v968_v13  ;;  %1006 = vmatmul.f32.vlgmr.msra.gmra.mxu1 %v969_v14 }
 0x478   :  { %1204 = vmatpush.msra.mxu0 %v2228_v45 }
 0x479   :  { %v1023_v17 = vadd.f32 %v1022_v16, %v1021_v15  ;;  %v1289_v16 = vld [vmem:[#allocation2 + $0xb8] sm:$0xff] }
 0x47f   :  { %1123 = vmatmul.f32.vlgmr.msrb.gmra.mxu0 %v1105_v21  ;;  %1143 = vmatmul.f32.vlgmr.msrb.gmra.mxu1 %v1106_v22 }
 0x480   :  { %1302 = vmatpush.msrb.mxu0 %v1289_v16 }
 0x4f4   :  { %v987_v23 = vpop.f32.mrf.mxu0  ;;  %v1007_v24 = vpop.f32.mrf.mxu1 }
 0x4f5   :  { %v1008_v26 = vadd.f32 %v1007_v24, %v987_v23 }
 0x4f7   :  { %v1010_v27 = vmul.f32 %v1008_v26, %v1008_v26 }
 0x4f9   :  { %v1011_v29 = vsel %vm222_vm4, %v1010_v27, 0.0 }
 0x4fa   :  { %1012 = vadd.xlane.f32.xlu2 %v1011_v29  ;;  %v1285_v29 = vld [vmem:[#allocation2 + $0x98] sm:$0xff] }
 0x4fc   :  { %v1124_v30 = vpop.f32.mrf.mxu0  ;;  %v1144_v31 = vpop.f32.mrf.mxu1 }
 0x4fd   :  { %v1145_v32 = vadd.f32 %v1144_v31, %v1124_v30  ;;  %v1284_v30 = vld [vmem:[#allocation2 + $0x90] sm:$0xff]  ;;  %v1282_v31 = vld [vmem:[#allocation2 + $0x80] sm:$0xff] }
 0x4ff   :  { %v1150_v33 = vsel %vm1149_vm9, %v1145_v32, -1e+30  ;;  %v1154_v35 = vsel %vm1149_vm9, -1e+30, %v1145_v32 }
 0x500   :  { %v1151_v34 = vsel %vm924_vm7, %v1150_v33, -inf  ;;  %v1155_v36 = vsel %vm924_vm7, %v1154_v35, -inf  ;;  %v1322_v33 = vld [vmem:[#allocation2 + $0xf0] sm:$0xff]  ;;  %v1319_v35 = vld [vmem:[#allocation2 + $0xd8] sm:$0xff] }
 0x501   :  { %1152 = vmax.xlane.f32.xlu0 %v1151_v34  ;;  %v1320_v34 = vld [vmem:[#allocation2 + $0xe0] sm:$0xff] }
 0x502   :  { %1024 = vadd.xlane.f32.xlu2 %v1023_v17  ;;  %v1288_v17 = vld [vmem:[#allocation2 + $0xb0] sm:$0xff] }
 0x503   :  { %1303 = vmatpush.msrb.mxu0 %v1288_v17 }
 0x505   :  { %1304 = vmatpush.msrb.mxu0 %v1287_v18 }
 0x507   :  { %1305 = vmatpush.msrb.mxu0 %v1286_v28 }
 0x509   :  { %1156 = vmax.xlane.f32.xlu0 %v1155_v36  ;;  %1306 = vmatpush.msrb.mxu0 %v1285_v29 }
 0x50b   :  { %1307 = vmatpush.msrb.mxu0 %v1284_v30 }
 0x56d   :  { %v1013_v37 = vpop.xlane.xlu2 %1012 }
 0x56e   :  { %v1014_v38 = vrot.slane %v1013_v37, 4 }
 0x570   :  { %v1015_v39 = vadd.f32 %v1014_v38, %v1013_v37 }
 0x572   :  { %v1016_v40 = vrot.slane %v1015_v39, 2 }
 0x574   :  { %v1153_v41 = vpop.xlane.xlu0 %1152  ;;  %v1017_v42 = vadd.f32 %v1016_v40, %v1015_v39  ;;  %v1318_v39 = vld [vmem:[#allocation2 + $0xd0] sm:$0xff]  ;;  %v1317_v40 = vld [vmem:[#allocation2 + $0xc8] sm:$0xff] }
 0x575   :  { %v1025_v19 = vpop.xlane.xlu2 %1024 }
 0x576   :  { %v1026_v48 = vrot.slane %v1025_v19, 4  ;;  %v1018_v51 = vrot.slane %v1017_v42, 1 }
 0x578   :  { %v1027_v45 = vadd.f32 %v1026_v48, %v1025_v19  ;;  %v1019_v60 = vadd.f32 %v1018_v51, %v1017_v42  ;;  %v1356_v42 = vld [vmem:[%s2482_s11 + $0x38] sm:$0xff]  ;;  %v1355_v19 = vld [vmem:[%s2482_s11 + $0x30] sm:$0xff]  ;;  %v1354_v48 = vld [vmem:[%s2482_s11 + $0x28] sm:$0xff] }
 0x579   :  { %1372 = vmatpush.msrb.mxu3 %v1356_v42  ;;  %v1353_v51 = vld [vmem:[%s2482_s11 + $0x20] sm:$0xff] }
 0x57a   :  { %v1028_v62 = vrot.slane %v1027_v45, 2  ;;  %1427 = vpush %v1019_v60  ;;  %v1454_v60 = vld [vmem:[#allocation4] sm:$0x1f] }
 0x57b   :  { %1373 = vmatpush.msrb.mxu3 %v1355_v19 }
 0x57c   :  { %v1029_v3 = vadd.f32 %v1028_v62, %v1027_v45  ;;  %v1157_v4 = vpop.xlane.xlu0 %1156  ;;  %v1352_v45 = vld [vmem:[%s2482_s11 + $0x18] sm:$0xff]  ;;  %v1290_v62 = vperm.slane %v1454_v60, 3 }
 0x57d   :  { %v1158_v6 = vsel %vm1149_vm9, %v1153_v41, %v1157_v4  ;;  %v1316_v41 = vld [vmem:[#allocation2 + $0xc0] sm:$0xff]  ;;  %1374 = vmatpush.msrb.mxu3 %v1354_v48 }
 0x57e   :  { %v1159_v9 = vsub.f32 %v1145_v32, %v1158_v6  ;;  %v1030_v12 = vrot.slane %v1029_v3, 1  ;;  %v1323_v32 = vld [vmem:[#allocation2 + $0xf8] sm:$0xff] }
 0x57f   :  { %1336 = vmatpush.msra.mxu1 %v1323_v32  ;;  %1375 = vmatpush.msrb.mxu3 %v1353_v51 }
 0x580   :  { %v1160_v43 = vmul.f32 1.442695, %v1159_v9  ;;  %v1031_v44 = vadd.f32 %v1030_v12, %v1029_v3  ;;  %v1351_v9 = vld [vmem:[%s2482_s11 + $0x10] sm:$0xff]  ;;  %v1350_v12 = vld [vmem:[%s2482_s11 + $0x8] sm:$0xff] }
 0x581   :  { %1337 = vmatpush.msra.mxu1 %v1322_v33  ;;  %1376 = vmatpush.msrb.mxu3 %v1352_v45 }
 0x582   :  { %1447 = vpow2.f32 %v1160_v43  ;;  %1429 = vpush %v1031_v44  ;;  %v1349_v43 = vld [vmem:[%s2482_s11] sm:$0xff]  ;;  %v1324_v44 = vperm.slane %v1454_v60, 4 }
 0x583   :  { %1377 = vmatpush.msrb.mxu3 %v1351_v9 }
 0x585   :  { %1378 = vmatpush.msrb.mxu3 %v1350_v12 }
 0x587   :  { %1379 = vmatpush.msrb.mxu3 %v1349_v43 }
 0x588   :  { %v1448_v46 = vpop.eup %1447 }
 0x589   :  { %v1162_v47 = vsel %vm1149_vm9, %v1448_v46, 0.0  ;;  %v1166_v53 = vsel %vm1149_vm9, 0.0, %v1448_v46 }
 0x58a   :  { %v1163_v50 = vsel %vm924_vm7, %v1162_v47, 0.0  ;;  %v1167_v56 = vsel %vm924_vm7, %v1166_v53, 0.0  ;;  %v1444_v53 = vld [vmem:[#allocation9] ss:$0 sm:$0xff] }
 0x58b   :  { %1164 = vadd.xlane.f32.xlu1 %v1163_v50 }
 0x593   :  { %1168 = vadd.xlane.f32.xlu1 %v1167_v56 }
 0x5ab   :  { %s1428_s15 = spop %1427 }
 0x5b3   :  { %s1430_s20 = spop %1429 }
 0x5b4   :  { %s1033_s1 = ssub.f32 %s1428_s15, %s1430_s20 }
 0x5b6   :  { %s1034_s22 = smul.f32 0.5, %s1033_s1 }
 0x5b8   :  { %s1035_s2 = smul.f32 0.020833334, %s1034_s22 }
 0x5ba   :  { %s1278_s8 = smul.f32 0.01, %s1035_s2 }
 0x5bc   :  { %v1279_v24 = vstv %s1278_s8 }
 0x5fe   :  { %v1165_v59 = vpop.xlane.xlu1 %1164 }
 0x606   :  { %v1169_v61 = vpop.xlane.xlu1 %1168 }
 0x607   :  { %v1170_v63 = vsel %vm1149_vm9, %v1165_v59, %v1169_v61 }
 0x608   :  { %1449 = vrcp.f32 %v1170_v63  ;;  %v1182_v52 = vand.u32 2147483648, %v1170_v63  ;;  %v1180_v5 = vand.u32 2147483647, %v1170_v63  ;;  %vm1176_vm11 = vweird.f32 %v1170_v63 }
 0x60a   :  { %v1183_v8 = vor.u32 1.1754944e-38, %v1182_v52  ;;  %vm1181_vm13 = vcmp.eq.f32.partialorder %v1180_v5, 8.507059e+37 }
 0x60e   :  { %v1450_v49 = vpop.eup %1449 }
 0x60f   :  { %v1172_v0 = vmul.f32 %v1450_v49, %v1170_v63  ;;  %vm1177_vm10 = vweird.f32 %v1450_v49 }
 0x610   :  { %vm1178_vm12 = vmor %vm1176_vm11, %vm1177_vm10 }
 0x611   :  { %v1173_v1 = vsub.f32 1.0, %v1172_v0 }
 0x613   :  { %v1174_v2 = vmul.f32 %v1450_v49, %v1173_v1 }
 0x615   :  { %v1175_v55 = vadd.f32 %v1450_v49, %v1174_v2 }
 0x617   :  { %v1179_v11 = vsel %vm1178_vm12, %v1450_v49, %v1175_v55 }
 0x618   :  { %v1184_v57 = vsel %vm1181_vm13, %v1183_v8, %v1179_v11 }
 0x619   :  { %v1185_v7 = vmul.f32 %v1448_v46, %v1184_v57 }
 0x61b   :  { %1422 = vmatmul.msk.f32.vlgmr.msra.gmra.mxu0 %vm924_vm7, %v1185_v7  ;;  %1423 = vmatmul.msk.f32.vlgmr.msrb.gmra.mxu2 %vm924_vm7, %v1185_v7  ;;  %v1271_v10 = vadd.f32 1e-06, %v1185_v7 }
 0x61d   :  { %1451 = vlog2.f32 %v1271_v10 }
 0x623   :  { %v1452_v13 = vpop.eup %1451 }
 0x624   :  { %v1273_v14 = vmul.f32 0.6931472, %v1452_v13 }
 0x626   :  { %v1274_v15 = vsel %vm924_vm7, %v1273_v14, 0.0 }
 0x627   :  { %1275 = vadd.xlane.f32.xlu0 %v1274_v15 }
 0x698   :  { %v1206_v20 = vpop.f32.mrf.mxu0 }
 0x699   :  { %v1229_v21 = vmul.f32 %v1206_v20, %v2217_v58  ;;  %v1283_v58 = vld [vmem:[#allocation2 + $0x88] sm:$0xff] }
 0x69a   :  { %v1276_v22 = vpop.xlane.xlu0 %1275  ;;  %1308 = vmatpush.msrb.mxu0 %v1283_v58 }
 0x69b   :  { %v1277_v23 = vmul.f32 -0.0025, %v1276_v22  ;;  %1247 = vmatmul.f32.vlgmr.msra.gmra.mxu3 %v1229_v21 }
 0x69c   :  { %1309 = vmatpush.msrb.mxu0 %v1282_v31 }
 0x69d   :  { %v1280_v25 = vadd.f32 %v1279_v24, %v1277_v23 }
 0x69e   :  { %v1226_v26 = vpop.f32.mrf.mxu2 }
 0x69f   :  { %v1230_v27 = vmul.f32 %v1226_v26, %v2213_v54  ;;  %1391 = vst.msk [vmem:[%s2490_s19] sm:$0xff] %vm1384_vm14, %v1280_v25  ;;  %v1321_v54 = vld [vmem:[#allocation2 + $0xe8] sm:$0xff] }
 0x6a0   :  { %1338 = vmatpush.msra.mxu1 %v1321_v54 }
 0x6a1   :  { %1267 = vmatmul.f32.vlgmr.msra.gmra.mxu2 %v1230_v27 }
 0x6a2   :  { %1339 = vmatpush.msra.mxu1 %v1320_v34 }
 0x6a4   :  { %1340 = vmatpush.msra.mxu1 %v1319_v35 }
 0x6a6   :  { %1341 = vmatpush.msra.mxu1 %v1318_v39 }
 0x6a8   :  { %1342 = vmatpush.msra.mxu1 %v1317_v40 }
 0x6aa   :  { %1343 = vmatpush.msra.mxu1 %v1316_v41 }
 0x71e   :  { %v1248_v36 = vpop.f32.mrf.mxu3 }
 0x724   :  { %v1268_v37 = vpop.f32.mrf.mxu2 }
 0x725   :  { %v1269_v38 = vadd.f32 %v1268_v37, %v1248_v36 }
 0x727   :  { %1424 = vmatmul.msk.f32.vlgmr.msrb.gmra.mxu0 %vm222_vm4, %v1269_v38 }
 0x7a4   :  { %v1311_v3 = vpop.f32.mrf.mxu0 }
 0x7a5   :  { %v1312_v4 = vadd.f32 %v1311_v3, %v1290_v62 }
 0x7a7   :  { %v1314_v6 = vmax.f32 %v1312_v4, 0.0 }
 0x7a9   :  { %1425 = vmatmul.msk.f32.vlgmr.msra.gmra.mxu1 %vm222_vm4, %v1314_v6 }
 0x826   :  { %v1345_v46 = vpop.f32.mrf.mxu1 }
 0x827   :  { %v1346_v47 = vadd.f32 %v1345_v46, %v1324_v44 }
 0x829   :  { %v1348_v50 = vmax.f32 %v1346_v47, 0.0 }
 0x82b   :  { %1426 = vmatmul.msk.f32.vlgmr.msrb.gmra.mxu3 %vm222_vm4, %v1348_v50 }
 0x8ae   :  { %v1381_v56 = vpop.f32.mrf.mxu3 }
 0x8af   :  { %v1382_v59 = vadd.f32 %v1444_v53, %v1381_v56 }
 0x8b1   :  { %1387 = vrot.lane.b32.xlu1 %v1382_v59, %s1619_s16  ;;  %1385 = vst.msk [vmem:[%s2488_s17] sm:$0xff] %vm1384_vm14, %v1382_v59 }
 0x923   :  { %v1388_v61 = vpop.permute.xlu1 %1387 }
 0x924   :  { %1390 = vst.msk [vmem:[%s2489_s18] sm:$0xff] %vm1384_vm14, %v1388_v61 }
 0x925   :  { %1404 = vsyncpa [#allocation3], 1 }
 0x926   :  { %1405 = vsyncpa [#allocation5], 1 }
 0x927   :  { %1406 = vsyncpa [#allocation8], 1 }
 0x928   :  { %1407 = vsyncpa [#allocation11], 1 }

</bundles_post_ra>
